<compile_context>
chip_gen: v7x
topology: tpu7x:2x2x1
jax: 0.10.0
libtpu: 0.0.40
codegen_flags: <defaults>
</compile_context>

<pallas_src>
import functools

import jax
import jax.numpy as jnp
from jax import lax
from jax.experimental import pallas as pl
from jax.experimental.pallas import tpu as pltpu


def _round_up(x, m):
    return (x + m - 1) // m * m


# ---------------------------------------------------------------------------
# Pallas kernel: the serial recurrence only (h_prev @ W_hh + gate nonlinearity)
# ---------------------------------------------------------------------------
def _lstm_recurrent_kernel(gin_ref, whh_ref, out_ref, h_scr, c_scr, *,
                           t_chunk, hp):
    """One grid step = one chunk of `t_chunk` timesteps.

    gin_ref : (t_chunk, Bp, 4*Hp)  precomputed x @ W_ih^T + (b_ih + b_hh),
                                   gate layout [i, f, o, g]
    whh_ref : (Hp, 4*Hp)           recurrent weights (same gate layout)
    out_ref : (t_chunk, Bp, Hp)    hidden states of this layer (lane-dense)
    h_scr, c_scr : (Bp, Hp)        LSTM state, carried across grid steps
    """
    @pl.when(pl.program_id(0) == 0)
    def _():
        h_scr[...] = jnp.zeros_like(h_scr)
        c_scr[...] = jnp.zeros_like(c_scr)

    w_hh = whh_ref[...]                                    # resident in VMEM

    def step(t, carry):
        h_prev, c_prev = carry
        gates = gin_ref[t] + jnp.dot(h_prev, w_hh,
                                     preferred_element_type=jnp.float32)
        # [i, f, o] as one contiguous lane-aligned 3*Hp slab, g as the last Hp.
        sig = jax.nn.sigmoid(gates[:, :3 * hp])
        g_g = jnp.tanh(gates[:, 3 * hp:])
        i_g = sig[:, 0 * hp:1 * hp]
        f_g = sig[:, 1 * hp:2 * hp]
        o_g = sig[:, 2 * hp:3 * hp]
        c_new = f_g * c_prev + i_g * g_g
        h_new = o_g * jnp.tanh(c_new)
        out_ref[t] = h_new.astype(out_ref.dtype)
        return h_new, c_new

    h_f, c_f = lax.fori_loop(0, t_chunk, step, (h_scr[...], c_scr[...]),
                             unroll=True)
    h_scr[...] = h_f
    c_scr[...] = c_f


def _lstm_recurrence(gin, w_hh, hp, t_chunk):
    """gin: (T_pad, Bp, 4*Hp), w_hh: (Hp, 4*Hp) -> (T_pad, Bp, Hp)."""
    t_pad, bp, g4 = gin.shape
    n_chunks = t_pad // t_chunk
    kernel = functools.partial(_lstm_recurrent_kernel, t_chunk=t_chunk, hp=hp)
    return pl.pallas_call(
        kernel,
        out_shape=jax.ShapeDtypeStruct((t_pad, bp, hp), jnp.float32),
        grid_spec=pltpu.PrefetchScalarGridSpec(
            num_scalar_prefetch=0,
            grid=(n_chunks,),
            in_specs=[
                pl.BlockSpec((t_chunk, bp, g4), lambda c: (c, 0, 0)),  # gate in
                pl.BlockSpec((hp, g4), lambda c: (0, 0)),              # W_hh
            ],
            out_specs=pl.BlockSpec((t_chunk, bp, hp), lambda c: (c, 0, 0)),
            scratch_shapes=[
                pltpu.VMEM((bp, hp), jnp.float32),   # h state
                pltpu.VMEM((bp, hp), jnp.float32),   # c state
            ],
        ),
        compiler_params=pltpu.CompilerParams(
            dimension_semantics=("arbitrary",),   # time recurrence is serial
            vmem_limit_bytes=64 * 1024 * 1024,
        ),
    )(gin, w_hh)


# ---------------------------------------------------------------------------
# Parameter re-layout: PyTorch [i,f,g,o] -> [i,f,o,g], pad H -> Hp (lane mult.)
# ---------------------------------------------------------------------------
def _pad_reorder_gates(w, h, hp):
    """Last axis is 4*h in PyTorch order [i,f,g,o]; return 4*hp in [i,f,o,g]."""
    i = w[..., 0 * h:1 * h]
    f = w[..., 1 * h:2 * h]
    g = w[..., 2 * h:3 * h]
    o = w[..., 3 * h:4 * h]

    def pad(x):
        widths = [(0, 0)] * (x.ndim - 1) + [(0, hp - h)]
        return jnp.pad(x, widths)

    return jnp.concatenate([pad(i), pad(f), pad(o), pad(g)], axis=-1)


def _prepare_params(params, hidden_size, hp):
    """PyTorch-layout (w_ih, w_hh, b_ih, b_hh) -> padded kernel layout."""
    h = hidden_size
    prepared = []
    for layer, (w_ih, w_hh, b_ih, b_hh) in enumerate(params):
        w_ih_p = _pad_reorder_gates(w_ih.T.astype(jnp.float32), h, hp)  # (in,4Hp)
        w_hh_p = _pad_reorder_gates(w_hh.T.astype(jnp.float32), h, hp)  # (H, 4Hp)
        bias_p = _pad_reorder_gates((b_ih + b_hh).astype(jnp.float32), h, hp)
        # Zero-pad the *input* rows so padded hidden columns never contaminate
        # real gates.
        w_hh_p = jnp.pad(w_hh_p, ((0, hp - h), (0, 0)))
        if layer > 0:
            w_ih_p = jnp.pad(w_ih_p, ((0, hp - h), (0, 0)))
        prepared.append((w_ih_p, w_hh_p, bias_p))
    return prepared


# ---------------------------------------------------------------------------
# Public forward: RecurrentModalModule(x) -> lstm_out   (B, T, H)
# ---------------------------------------------------------------------------
def recurrent_modal_module(x, params, hidden_size, t_chunk=32):
    b, t, _ = x.shape
    h = hidden_size
    hp = _round_up(h, 128)                   # lane-aligned hidden size
    bp = _round_up(max(b, 8), 8)             # sublane-aligned batch
    tc = min(t_chunk, t)
    t_pad = pl.cdiv(t, tc) * tc

    prep = _prepare_params(params, h, hp)

    # time-major, padded (padding is zeros; real rows/cols are unaffected)
    x_tm = jnp.transpose(x, (1, 0, 2)).astype(jnp.float32)          # (T, B, F)
    x_tm = jnp.pad(x_tm, ((0, t_pad - t), (0, bp - b), (0, 0)))

    h_tm = x_tm
    for (w_ih_p, w_hh_p, bias_p) in prep:
        # Hoisted input projection: one big parallel MXU matmul over all steps.
        gin = jnp.einsum('tbf,fg->tbg', h_tm, w_ih_p,
                         preferred_element_type=jnp.float32) + bias_p
        # Serial recurrence in Pallas.
        h_tm = _lstm_recurrence(gin, w_hh_p, hp, tc)

    out = h_tm[:t, :b, :h]
    return jnp.transpose(out, (1, 0, 2))                             # (B, T, H)


# ---------------------------------------------------------------------------
# Deterministic PyTorch-style parameter init + pure-JAX reference
# ---------------------------------------------------------------------------
def init_lstm_params(key, input_size, hidden_size, n_layers):
    params = []
    k = 1.0 / float(hidden_size) ** 0.5
    for layer in range(n_layers):
        in_f = input_size if layer == 0 else hidden_size
        key, k1, k2, k3, k4 = jax.random.split(key, 5)
        w_ih = jax.random.uniform(k1, (4 * hidden_size, in_f),
                                  minval=-k, maxval=k, dtype=jnp.float32)
        w_hh = jax.random.uniform(k2, (4 * hidden_size, hidden_size),
                                  minval=-k, maxval=k, dtype=jnp.float32)
        b_ih = jax.random.uniform(k3, (4 * hidden_size,),
                                  minval=-k, maxval=k, dtype=jnp.float32)
        b_hh = jax.random.uniform(k4, (4 * hidden_size,),
                                  minval=-k, maxval=k, dtype=jnp.float32)
        params.append((w_ih, w_hh, b_ih, b_hh))
    return params


def lstm_reference(x, params, hidden_size):
    """Pure-JAX lax.scan reference replicating nn.LSTM(batch_first=True)."""
    b = x.shape[0]
    h_seq = jnp.transpose(x, (1, 0, 2)).astype(jnp.float32)
    for (w_ih, w_hh, b_ih, b_hh) in params:
        def step(carry, x_t, w_ih=w_ih, w_hh=w_hh, b_ih=b_ih, b_hh=b_hh):
            h_st, c_st = carry
            gates = x_t @ w_ih.T + h_st @ w_hh.T + b_ih + b_hh
            hh = hidden_size
            i = jax.nn.sigmoid(gates[:, 0 * hh:1 * hh])
            f = jax.nn.sigmoid(gates[:, 1 * hh:2 * hh])
            g = jnp.tanh(gates[:, 2 * hh:3 * hh])
            o = jax.nn.sigmoid(gates[:, 3 * hh:4 * hh])
            c_st = f * c_st + i * g
            h_st = o * jnp.tanh(c_st)
            return (h_st, c_st), h_st

        init = (jnp.zeros((b, hidden_size), jnp.float32),
                jnp.zeros((b, hidden_size), jnp.float32))
        _, h_seq = jax.lax.scan(step, init, h_seq)
    return jnp.transpose(h_seq, (1, 0, 2))


if __name__ == "__main__":
    B, T = 2, 8
    input_size, hidden_size, n_layers = 4, 32, 2

    key = jax.random.PRNGKey(0)
    key, kx = jax.random.split(key)
    x = jax.random.normal(kx, (B, T, input_size), dtype=jnp.float32)
    params = init_lstm_params(key, input_size, hidden_size, n_layers)

    fwd = jax.jit(functools.partial(recurrent_modal_module,
                                    hidden_size=hidden_size))
    out = jax.block_until_ready(fwd(x, params))

    ref = lstm_reference(x, params, hidden_size)
    assert out.shape == (B, T, hidden_size), out.shape
    max_err = float(jnp.max(jnp.abs(out - ref)))
    assert jnp.allclose(out, ref, atol=1e-4, rtol=1e-4), f"mismatch: {max_err}"

    print("KERNEL_OK")
</pallas_src>

<mosaic_0001>
module attributes {stable_mosaic.version = 11 : i64} {
  func.func @_lstm_recurrent_kernel(%arg0: i32, %arg1: memref<8x8x512xf32, #tpu.memory_space<vmem>>, %arg2: memref<128x512xf32, #tpu.memory_space<vmem>>, %arg3: memref<8x8x128xf32, #tpu.memory_space<vmem>>, %arg4: memref<8x128xf32, #tpu.memory_space<vmem>>, %arg5: memref<8x128xf32, #tpu.memory_space<vmem>>) attributes {dimension_semantics = [#tpu.dimension_semantics<arbitrary>], iteration_bounds = array<i64: 1>, scalar_prefetch = 0 : i64, scratch_operands = 2 : i64, tpu.core_type = #tpu.core_type<tc>, window_params = [{transform_indices = @transform_0, window_bounds = array<i64: 8, 8, 512>}, {pipeline_mode = #tpu.pipeline_mode<synchronous>, transform_indices = @transform_1, window_bounds = array<i64: 128, 512>}, {transform_indices = @transform_2, window_bounds = array<i64: 8, 8, 128>}]} {
    %c0_i32 = arith.constant 0 : i32
    %0 = arith.cmpi eq, %arg0, %c0_i32 : i32
    %1 = arith.extui %0 : i1 to i32
    %c0_i32_0 = arith.constant 0 : i32
    %2 = arith.cmpi ne, %1, %c0_i32_0 : i32
    scf.if %2 {
      %cst_58 = arith.constant 0.000000e+00 : f32
      %208 = vector.broadcast %cst_58 : f32 to vector<8x128xf32>
      %c0_59 = arith.constant 0 : index
      %c0_60 = arith.constant 0 : index
      %209 = vector.load %arg4[%c0_59, %c0_60] : memref<8x128xf32, #tpu.memory_space<vmem>>, vector<8x128xf32>
      tpu.vector_store %arg4[%c0_59, %c0_60], %208 {strides = array<i32>} : memref<8x128xf32, #tpu.memory_space<vmem>>, vector<8x128xf32>,
      %cst_61 = arith.constant 0.000000e+00 : f32
      %210 = vector.broadcast %cst_61 : f32 to vector<8x128xf32>
      %c0_62 = arith.constant 0 : index
      %c0_63 = arith.constant 0 : index
      %211 = vector.load %arg5[%c0_62, %c0_63] : memref<8x128xf32, #tpu.memory_space<vmem>>, vector<8x128xf32>
      tpu.vector_store %arg5[%c0_62, %c0_63], %210 {strides = array<i32>} : memref<8x128xf32, #tpu.memory_space<vmem>>, vector<8x128xf32>,
    } else {
    }
    %c0 = arith.constant 0 : index
    %c0_1 = arith.constant 0 : index
    %3 = vector.load %arg2[%c0, %c0_1] : memref<128x512xf32, #tpu.memory_space<vmem>>, vector<128x512xf32>
    %c0_2 = arith.constant 0 : index
    %c0_3 = arith.constant 0 : index
    %4 = vector.load %arg4[%c0_2, %c0_3] : memref<8x128xf32, #tpu.memory_space<vmem>>, vector<8x128xf32>
    %c0_4 = arith.constant 0 : index
    %c0_5 = arith.constant 0 : index
    %5 = vector.load %arg5[%c0_4, %c0_5] : memref<8x128xf32, #tpu.memory_space<vmem>>, vector<8x128xf32>
    %c0_i32_6 = arith.constant 0 : i32
    %6 = arith.index_cast %c0_i32_6 : i32 to index
    %c0_7 = arith.constant 0 : index
    %c0_8 = arith.constant 0 : index
    %7 = vector.load %arg1[%6, %c0_7, %c0_8] : memref<8x8x512xf32, #tpu.memory_space<vmem>>, vector<1x8x512xf32>
    %8 = vector.shape_cast %7 : vector<1x8x512xf32> to vector<8x512xf32>
    %cst = arith.constant dense<0.000000e+00> : vector<8x512xf32>
    %9 = tpu.matmul %4, %3, %cst {dimension_numbers = #tpu.dot_dimension_numbers<[1], [0], [0], [1], [0, 0, 1, 1], [], []>} : vector<8x128xf32>, vector<128x512xf32>, vector<8x512xf32> -> vector<8x512xf32>
    %10 = arith.addf %8, %9 : vector<8x512xf32>
    %11 = vector.extract_strided_slice %10 {offsets = [0, 0], sizes = [8, 384], strides = [1, 1]} : vector<8x512xf32> to vector<8x384xf32>
    %12 = arith.negf %11 : vector<8x384xf32>
    %13 = math.exp %12 : vector<8x384xf32>
    %cst_9 = arith.constant 1.000000e+00 : f32
    %14 = vector.broadcast %cst_9 : f32 to vector<8x384xf32>
    %15 = arith.addf %14, %13 : vector<8x384xf32>
    %16 = arith.divf %14, %15 : vector<8x384xf32>
    %17 = vector.extract_strided_slice %10 {offsets = [0, 384], sizes = [8, 128], strides = [1, 1]} : vector<8x512xf32> to vector<8x128xf32>
    %18 = math.tanh %17 : vector<8x128xf32>
    %19 = vector.extract_strided_slice %16 {offsets = [0, 0], sizes = [8, 128], strides = [1, 1]} : vector<8x384xf32> to vector<8x128xf32>
    %20 = vector.extract_strided_slice %16 {offsets = [0, 128], sizes = [8, 128], strides = [1, 1]} : vector<8x384xf32> to vector<8x128xf32>
    %21 = vector.extract_strided_slice %16 {offsets = [0, 256], sizes = [8, 128], strides = [1, 1]} : vector<8x384xf32> to vector<8x128xf32>
    %22 = arith.mulf %20, %5 : vector<8x128xf32>
    %23 = arith.mulf %19, %18 : vector<8x128xf32>
    %24 = arith.addf %22, %23 : vector<8x128xf32>
    %25 = math.tanh %24 : vector<8x128xf32>
    %26 = arith.mulf %21, %25 : vector<8x128xf32>
    %27 = arith.index_cast %c0_i32_6 : i32 to index
    %c0_10 = arith.constant 0 : index
    %c0_11 = arith.constant 0 : index
    %28 = vector.load %arg3[%27, %c0_10, %c0_11] : memref<8x8x128xf32, #tpu.memory_space<vmem>>, vector<1x8x128xf32>
    %29 = vector.shape_cast %28 : vector<1x8x128xf32> to vector<8x128xf32>
    %30 = vector.shape_cast %26 : vector<8x128xf32> to vector<1x8x128xf32>
    tpu.vector_store %arg3[%27, %c0_10, %c0_11], %30 {strides = array<i32>} : memref<8x8x128xf32, #tpu.memory_space<vmem>>, vector<1x8x128xf32>,
    %c1_i32 = arith.constant 1 : i32
    %31 = arith.index_cast %c1_i32 : i32 to index
    %c0_12 = arith.constant 0 : index
    %c0_13 = arith.constant 0 : index
    %32 = vector.load %arg1[%31, %c0_12, %c0_13] : memref<8x8x512xf32, #tpu.memory_space<vmem>>, vector<1x8x512xf32>
    %33 = vector.shape_cast %32 : vector<1x8x512xf32> to vector<8x512xf32>
    %cst_14 = arith.constant dense<0.000000e+00> : vector<8x512xf32>
    %34 = tpu.matmul %26, %3, %cst_14 {dimension_numbers = #tpu.dot_dimension_numbers<[1], [0], [0], [1], [0, 0, 1, 1], [], []>} : vector<8x128xf32>, vector<128x512xf32>, vector<8x512xf32> -> vector<8x512xf32>
    %35 = arith.addf %33, %34 : vector<8x512xf32>
    %36 = vector.extract_strided_slice %35 {offsets = [0, 0], sizes = [8, 384], strides = [1, 1]} : vector<8x512xf32> to vector<8x384xf32>
    %37 = arith.negf %36 : vector<8x384xf32>
    %38 = math.exp %37 : vector<8x384xf32>
    %cst_15 = arith.constant 1.000000e+00 : f32
    %39 = vector.broadcast %cst_15 : f32 to vector<8x384xf32>
    %40 = arith.addf %39, %38 : vector<8x384xf32>
    %41 = arith.divf %39, %40 : vector<8x384xf32>
    %42 = vector.extract_strided_slice %35 {offsets = [0, 384], sizes = [8, 128], strides = [1, 1]} : vector<8x512xf32> to vector<8x128xf32>
    %43 = math.tanh %42 : vector<8x128xf32>
    %44 = vector.extract_strided_slice %41 {offsets = [0, 0], sizes = [8, 128], strides = [1, 1]} : vector<8x384xf32> to vector<8x128xf32>
    %45 = vector.extract_strided_slice %41 {offsets = [0, 128], sizes = [8, 128], strides = [1, 1]} : vector<8x384xf32> to vector<8x128xf32>
    %46 = vector.extract_strided_slice %41 {offsets = [0, 256], sizes = [8, 128], strides = [1, 1]} : vector<8x384xf32> to vector<8x128xf32>
    %47 = arith.mulf %45, %24 : vector<8x128xf32>
    %48 = arith.mulf %44, %43 : vector<8x128xf32>
    %49 = arith.addf %47, %48 : vector<8x128xf32>
    %50 = math.tanh %49 : vector<8x128xf32>
    %51 = arith.mulf %46, %50 : vector<8x128xf32>
    %52 = arith.index_cast %c1_i32 : i32 to index
    %c0_16 = arith.constant 0 : index
    %c0_17 = arith.constant 0 : index
    %53 = vector.load %arg3[%52, %c0_16, %c0_17] : memref<8x8x128xf32, #tpu.memory_space<vmem>>, vector<1x8x128xf32>
    %54 = vector.shape_cast %53 : vector<1x8x128xf32> to vector<8x128xf32>
    %55 = vector.shape_cast %51 : vector<8x128xf32> to vector<1x8x128xf32>
    tpu.vector_store %arg3[%52, %c0_16, %c0_17], %55 {strides = array<i32>} : memref<8x8x128xf32, #tpu.memory_space<vmem>>, vector<1x8x128xf32>,
    %c2_i32 = arith.constant 2 : i32
    %56 = arith.index_cast %c2_i32 : i32 to index
    %c0_18 = arith.constant 0 : index
    %c0_19 = arith.constant 0 : index
    %57 = vector.load %arg1[%56, %c0_18, %c0_19] : memref<8x8x512xf32, #tpu.memory_space<vmem>>, vector<1x8x512xf32>
    %58 = vector.shape_cast %57 : vector<1x8x512xf32> to vector<8x512xf32>
    %cst_20 = arith.constant dense<0.000000e+00> : vector<8x512xf32>
    %59 = tpu.matmul %51, %3, %cst_20 {dimension_numbers = #tpu.dot_dimension_numbers<[1], [0], [0], [1], [0, 0, 1, 1], [], []>} : vector<8x128xf32>, vector<128x512xf32>, vector<8x512xf32> -> vector<8x512xf32>
    %60 = arith.addf %58, %59 : vector<8x512xf32>
    %61 = vector.extract_strided_slice %60 {offsets = [0, 0], sizes = [8, 384], strides = [1, 1]} : vector<8x512xf32> to vector<8x384xf32>
    %62 = arith.negf %61 : vector<8x384xf32>
    %63 = math.exp %62 : vector<8x384xf32>
    %cst_21 = arith.constant 1.000000e+00 : f32
    %64 = vector.broadcast %cst_21 : f32 to vector<8x384xf32>
    %65 = arith.addf %64, %63 : vector<8x384xf32>
    %66 = arith.divf %64, %65 : vector<8x384xf32>
    %67 = vector.extract_strided_slice %60 {offsets = [0, 384], sizes = [8, 128], strides = [1, 1]} : vector<8x512xf32> to vector<8x128xf32>
    %68 = math.tanh %67 : vector<8x128xf32>
    %69 = vector.extract_strided_slice %66 {offsets = [0, 0], sizes = [8, 128], strides = [1, 1]} : vector<8x384xf32> to vector<8x128xf32>
    %70 = vector.extract_strided_slice %66 {offsets = [0, 128], sizes = [8, 128], strides = [1, 1]} : vector<8x384xf32> to vector<8x128xf32>
    %71 = vector.extract_strided_slice %66 {offsets = [0, 256], sizes = [8, 128], strides = [1, 1]} : vector<8x384xf32> to vector<8x128xf32>
    %72 = arith.mulf %70, %49 : vector<8x128xf32>
    %73 = arith.mulf %69, %68 : vector<8x128xf32>
    %74 = arith.addf %72, %73 : vector<8x128xf32>
    %75 = math.tanh %74 : vector<8x128xf32>
    %76 = arith.mulf %71, %75 : vector<8x128xf32>
    %77 = arith.index_cast %c2_i32 : i32 to index
    %c0_22 = arith.constant 0 : index
    %c0_23 = arith.constant 0 : index
    %78 = vector.load %arg3[%77, %c0_22, %c0_23] : memref<8x8x128xf32, #tpu.memory_space<vmem>>, vector<1x8x128xf32>
    %79 = vector.shape_cast %78 : vector<1x8x128xf32> to vector<8x128xf32>
    %80 = vector.shape_cast %76 : vector<8x128xf32> to vector<1x8x128xf32>
    tpu.vector_store %arg3[%77, %c0_22, %c0_23], %80 {strides = array<i32>} : memref<8x8x128xf32, #tpu.memory_space<vmem>>, vector<1x8x128xf32>,
    %c3_i32 = arith.constant 3 : i32
    %81 = arith.index_cast %c3_i32 : i32 to index
    %c0_24 = arith.constant 0 : index
    %c0_25 = arith.constant 0 : index
    %82 = vector.load %arg1[%81, %c0_24, %c0_25] : memref<8x8x512xf32, #tpu.memory_space<vmem>>, vector<1x8x512xf32>
    %83 = vector.shape_cast %82 : vector<1x8x512xf32> to vector<8x512xf32>
    %cst_26 = arith.constant dense<0.000000e+00> : vector<8x512xf32>
    %84 = tpu.matmul %76, %3, %cst_26 {dimension_numbers = #tpu.dot_dimension_numbers<[1], [0], [0], [1], [0, 0, 1, 1], [], []>} : vector<8x128xf32>, vector<128x512xf32>, vector<8x512xf32> -> vector<8x512xf32>
    %85 = arith.addf %83, %84 : vector<8x512xf32>
    %86 = vector.extract_strided_slice %85 {offsets = [0, 0], sizes = [8, 384], strides = [1, 1]} : vector<8x512xf32> to vector<8x384xf32>
    %87 = arith.negf %86 : vector<8x384xf32>
    %88 = math.exp %87 : vector<8x384xf32>
    %cst_27 = arith.constant 1.000000e+00 : f32
    %89 = vector.broadcast %cst_27 : f32 to vector<8x384xf32>
    %90 = arith.addf %89, %88 : vector<8x384xf32>
    %91 = arith.divf %89, %90 : vector<8x384xf32>
    %92 = vector.extract_strided_slice %85 {offsets = [0, 384], sizes = [8, 128], strides = [1, 1]} : vector<8x512xf32> to vector<8x128xf32>
    %93 = math.tanh %92 : vector<8x128xf32>
    %94 = vector.extract_strided_slice %91 {offsets = [0, 0], sizes = [8, 128], strides = [1, 1]} : vector<8x384xf32> to vector<8x128xf32>
    %95 = vector.extract_strided_slice %91 {offsets = [0, 128], sizes = [8, 128], strides = [1, 1]} : vector<8x384xf32> to vector<8x128xf32>
    %96 = vector.extract_strided_slice %91 {offsets = [0, 256], sizes = [8, 128], strides = [1, 1]} : vector<8x384xf32> to vector<8x128xf32>
    %97 = arith.mulf %95, %74 : vector<8x128xf32>
    %98 = arith.mulf %94, %93 : vector<8x128xf32>
    %99 = arith.addf %97, %98 : vector<8x128xf32>
    %100 = math.tanh %99 : vector<8x128xf32>
    %101 = arith.mulf %96, %100 : vector<8x128xf32>
    %102 = arith.index_cast %c3_i32 : i32 to index
    %c0_28 = arith.constant 0 : index
    %c0_29 = arith.constant 0 : index
    %103 = vector.load %arg3[%102, %c0_28, %c0_29] : memref<8x8x128xf32, #tpu.memory_space<vmem>>, vector<1x8x128xf32>
    %104 = vector.shape_cast %103 : vector<1x8x128xf32> to vector<8x128xf32>
    %105 = vector.shape_cast %101 : vector<8x128xf32> to vector<1x8x128xf32>
    tpu.vector_store %arg3[%102, %c0_28, %c0_29], %105 {strides = array<i32>} : memref<8x8x128xf32, #tpu.memory_space<vmem>>, vector<1x8x128xf32>,
    %c4_i32 = arith.constant 4 : i32
    %106 = arith.index_cast %c4_i32 : i32 to index
    %c0_30 = arith.constant 0 : index
    %c0_31 = arith.constant 0 : index
    %107 = vector.load %arg1[%106, %c0_30, %c0_31] : memref<8x8x512xf32, #tpu.memory_space<vmem>>, vector<1x8x512xf32>
    %108 = vector.shape_cast %107 : vector<1x8x512xf32> to vector<8x512xf32>
    %cst_32 = arith.constant dense<0.000000e+00> : vector<8x512xf32>
    %109 = tpu.matmul %101, %3, %cst_32 {dimension_numbers = #tpu.dot_dimension_numbers<[1], [0], [0], [1], [0, 0, 1, 1], [], []>} : vector<8x128xf32>, vector<128x512xf32>, vector<8x512xf32> -> vector<8x512xf32>
    %110 = arith.addf %108, %109 : vector<8x512xf32>
    %111 = vector.extract_strided_slice %110 {offsets = [0, 0], sizes = [8, 384], strides = [1, 1]} : vector<8x512xf32> to vector<8x384xf32>
    %112 = arith.negf %111 : vector<8x384xf32>
    %113 = math.exp %112 : vector<8x384xf32>
    %cst_33 = arith.constant 1.000000e+00 : f32
    %114 = vector.broadcast %cst_33 : f32 to vector<8x384xf32>
    %115 = arith.addf %114, %113 : vector<8x384xf32>
    %116 = arith.divf %114, %115 : vector<8x384xf32>
    %117 = vector.extract_strided_slice %110 {offsets = [0, 384], sizes = [8, 128], strides = [1, 1]} : vector<8x512xf32> to vector<8x128xf32>
    %118 = math.tanh %117 : vector<8x128xf32>
    %119 = vector.extract_strided_slice %116 {offsets = [0, 0], sizes = [8, 128], strides = [1, 1]} : vector<8x384xf32> to vector<8x128xf32>
    %120 = vector.extract_strided_slice %116 {offsets = [0, 128], sizes = [8, 128], strides = [1, 1]} : vector<8x384xf32> to vector<8x128xf32>
    %121 = vector.extract_strided_slice %116 {offsets = [0, 256], sizes = [8, 128], strides = [1, 1]} : vector<8x384xf32> to vector<8x128xf32>
    %122 = arith.mulf %120, %99 : vector<8x128xf32>
    %123 = arith.mulf %119, %118 : vector<8x128xf32>
    %124 = arith.addf %122, %123 : vector<8x128xf32>
    %125 = math.tanh %124 : vector<8x128xf32>
    %126 = arith.mulf %121, %125 : vector<8x128xf32>
    %127 = arith.index_cast %c4_i32 : i32 to index
    %c0_34 = arith.constant 0 : index
    %c0_35 = arith.constant 0 : index
    %128 = vector.load %arg3[%127, %c0_34, %c0_35] : memref<8x8x128xf32, #tpu.memory_space<vmem>>, vector<1x8x128xf32>
    %129 = vector.shape_cast %128 : vector<1x8x128xf32> to vector<8x128xf32>
    %130 = vector.shape_cast %126 : vector<8x128xf32> to vector<1x8x128xf32>
    tpu.vector_store %arg3[%127, %c0_34, %c0_35], %130 {strides = array<i32>} : memref<8x8x128xf32, #tpu.memory_space<vmem>>, vector<1x8x128xf32>,
    %c5_i32 = arith.constant 5 : i32
    %131 = arith.index_cast %c5_i32 : i32 to index
    %c0_36 = arith.constant 0 : index
    %c0_37 = arith.constant 0 : index
    %132 = vector.load %arg1[%131, %c0_36, %c0_37] : memref<8x8x512xf32, #tpu.memory_space<vmem>>, vector<1x8x512xf32>
    %133 = vector.shape_cast %132 : vector<1x8x512xf32> to vector<8x512xf32>
    %cst_38 = arith.constant dense<0.000000e+00> : vector<8x512xf32>
    %134 = tpu.matmul %126, %3, %cst_38 {dimension_numbers = #tpu.dot_dimension_numbers<[1], [0], [0], [1], [0, 0, 1, 1], [], []>} : vector<8x128xf32>, vector<128x512xf32>, vector<8x512xf32> -> vector<8x512xf32>
    %135 = arith.addf %133, %134 : vector<8x512xf32>
    %136 = vector.extract_strided_slice %135 {offsets = [0, 0], sizes = [8, 384], strides = [1, 1]} : vector<8x512xf32> to vector<8x384xf32>
    %137 = arith.negf %136 : vector<8x384xf32>
    %138 = math.exp %137 : vector<8x384xf32>
    %cst_39 = arith.constant 1.000000e+00 : f32
    %139 = vector.broadcast %cst_39 : f32 to vector<8x384xf32>
    %140 = arith.addf %139, %138 : vector<8x384xf32>
    %141 = arith.divf %139, %140 : vector<8x384xf32>
    %142 = vector.extract_strided_slice %135 {offsets = [0, 384], sizes = [8, 128], strides = [1, 1]} : vector<8x512xf32> to vector<8x128xf32>
    %143 = math.tanh %142 : vector<8x128xf32>
    %144 = vector.extract_strided_slice %141 {offsets = [0, 0], sizes = [8, 128], strides = [1, 1]} : vector<8x384xf32> to vector<8x128xf32>
    %145 = vector.extract_strided_slice %141 {offsets = [0, 128], sizes = [8, 128], strides = [1, 1]} : vector<8x384xf32> to vector<8x128xf32>
    %146 = vector.extract_strided_slice %141 {offsets = [0, 256], sizes = [8, 128], strides = [1, 1]} : vector<8x384xf32> to vector<8x128xf32>
    %147 = arith.mulf %145, %124 : vector<8x128xf32>
    %148 = arith.mulf %144, %143 : vector<8x128xf32>
    %149 = arith.addf %147, %148 : vector<8x128xf32>
    %150 = math.tanh %149 : vector<8x128xf32>
    %151 = arith.mulf %146, %150 : vector<8x128xf32>
    %152 = arith.index_cast %c5_i32 : i32 to index
    %c0_40 = arith.constant 0 : index
    %c0_41 = arith.constant 0 : index
    %153 = vector.load %arg3[%152, %c0_40, %c0_41] : memref<8x8x128xf32, #tpu.memory_space<vmem>>, vector<1x8x128xf32>
    %154 = vector.shape_cast %153 : vector<1x8x128xf32> to vector<8x128xf32>
    %155 = vector.shape_cast %151 : vector<8x128xf32> to vector<1x8x128xf32>
    tpu.vector_store %arg3[%152, %c0_40, %c0_41], %155 {strides = array<i32>} : memref<8x8x128xf32, #tpu.memory_space<vmem>>, vector<1x8x128xf32>,
    %c6_i32 = arith.constant 6 : i32
    %156 = arith.index_cast %c6_i32 : i32 to index
    %c0_42 = arith.constant 0 : index
    %c0_43 = arith.constant 0 : index
    %157 = vector.load %arg1[%156, %c0_42, %c0_43] : memref<8x8x512xf32, #tpu.memory_space<vmem>>, vector<1x8x512xf32>
    %158 = vector.shape_cast %157 : vector<1x8x512xf32> to vector<8x512xf32>
    %cst_44 = arith.constant dense<0.000000e+00> : vector<8x512xf32>
    %159 = tpu.matmul %151, %3, %cst_44 {dimension_numbers = #tpu.dot_dimension_numbers<[1], [0], [0], [1], [0, 0, 1, 1], [], []>} : vector<8x128xf32>, vector<128x512xf32>, vector<8x512xf32> -> vector<8x512xf32>
    %160 = arith.addf %158, %159 : vector<8x512xf32>
    %161 = vector.extract_strided_slice %160 {offsets = [0, 0], sizes = [8, 384], strides = [1, 1]} : vector<8x512xf32> to vector<8x384xf32>
    %162 = arith.negf %161 : vector<8x384xf32>
    %163 = math.exp %162 : vector<8x384xf32>
    %cst_45 = arith.constant 1.000000e+00 : f32
    %164 = vector.broadcast %cst_45 : f32 to vector<8x384xf32>
    %165 = arith.addf %164, %163 : vector<8x384xf32>
    %166 = arith.divf %164, %165 : vector<8x384xf32>
    %167 = vector.extract_strided_slice %160 {offsets = [0, 384], sizes = [8, 128], strides = [1, 1]} : vector<8x512xf32> to vector<8x128xf32>
    %168 = math.tanh %167 : vector<8x128xf32>
    %169 = vector.extract_strided_slice %166 {offsets = [0, 0], sizes = [8, 128], strides = [1, 1]} : vector<8x384xf32> to vector<8x128xf32>
    %170 = vector.extract_strided_slice %166 {offsets = [0, 128], sizes = [8, 128], strides = [1, 1]} : vector<8x384xf32> to vector<8x128xf32>
    %171 = vector.extract_strided_slice %166 {offsets = [0, 256], sizes = [8, 128], strides = [1, 1]} : vector<8x384xf32> to vector<8x128xf32>
    %172 = arith.mulf %170, %149 : vector<8x128xf32>
    %173 = arith.mulf %169, %168 : vector<8x128xf32>
    %174 = arith.addf %172, %173 : vector<8x128xf32>
    %175 = math.tanh %174 : vector<8x128xf32>
    %176 = arith.mulf %171, %175 : vector<8x128xf32>
    %177 = arith.index_cast %c6_i32 : i32 to index
    %c0_46 = arith.constant 0 : index
    %c0_47 = arith.constant 0 : index
    %178 = vector.load %arg3[%177, %c0_46, %c0_47] : memref<8x8x128xf32, #tpu.memory_space<vmem>>, vector<1x8x128xf32>
    %179 = vector.shape_cast %178 : vector<1x8x128xf32> to vector<8x128xf32>
    %180 = vector.shape_cast %176 : vector<8x128xf32> to vector<1x8x128xf32>
    tpu.vector_store %arg3[%177, %c0_46, %c0_47], %180 {strides = array<i32>} : memref<8x8x128xf32, #tpu.memory_space<vmem>>, vector<1x8x128xf32>,
    %c7_i32 = arith.constant 7 : i32
    %181 = arith.index_cast %c7_i32 : i32 to index
    %c0_48 = arith.constant 0 : index
    %c0_49 = arith.constant 0 : index
    %182 = vector.load %arg1[%181, %c0_48, %c0_49] : memref<8x8x512xf32, #tpu.memory_space<vmem>>, vector<1x8x512xf32>
    %183 = vector.shape_cast %182 : vector<1x8x512xf32> to vector<8x512xf32>
    %cst_50 = arith.constant dense<0.000000e+00> : vector<8x512xf32>
    %184 = tpu.matmul %176, %3, %cst_50 {dimension_numbers = #tpu.dot_dimension_numbers<[1], [0], [0], [1], [0, 0, 1, 1], [], []>} : vector<8x128xf32>, vector<128x512xf32>, vector<8x512xf32> -> vector<8x512xf32>
    %185 = arith.addf %183, %184 : vector<8x512xf32>
    %186 = vector.extract_strided_slice %185 {offsets = [0, 0], sizes = [8, 384], strides = [1, 1]} : vector<8x512xf32> to vector<8x384xf32>
    %187 = arith.negf %186 : vector<8x384xf32>
    %188 = math.exp %187 : vector<8x384xf32>
    %cst_51 = arith.constant 1.000000e+00 : f32
    %189 = vector.broadcast %cst_51 : f32 to vector<8x384xf32>
    %190 = arith.addf %189, %188 : vector<8x384xf32>
    %191 = arith.divf %189, %190 : vector<8x384xf32>
    %192 = vector.extract_strided_slice %185 {offsets = [0, 384], sizes = [8, 128], strides = [1, 1]} : vector<8x512xf32> to vector<8x128xf32>
    %193 = math.tanh %192 : vector<8x128xf32>
    %194 = vector.extract_strided_slice %191 {offsets = [0, 0], sizes = [8, 128], strides = [1, 1]} : vector<8x384xf32> to vector<8x128xf32>
    %195 = vector.extract_strided_slice %191 {offsets = [0, 128], sizes = [8, 128], strides = [1, 1]} : vector<8x384xf32> to vector<8x128xf32>
    %196 = vector.extract_strided_slice %191 {offsets = [0, 256], sizes = [8, 128], strides = [1, 1]} : vector<8x384xf32> to vector<8x128xf32>
    %197 = arith.mulf %195, %174 : vector<8x128xf32>
    %198 = arith.mulf %194, %193 : vector<8x128xf32>
    %199 = arith.addf %197, %198 : vector<8x128xf32>
    %200 = math.tanh %199 : vector<8x128xf32>
    %201 = arith.mulf %196, %200 : vector<8x128xf32>
    %202 = arith.index_cast %c7_i32 : i32 to index
    %c0_52 = arith.constant 0 : index
    %c0_53 = arith.constant 0 : index
    %203 = vector.load %arg3[%202, %c0_52, %c0_53] : memref<8x8x128xf32, #tpu.memory_space<vmem>>, vector<1x8x128xf32>
    %204 = vector.shape_cast %203 : vector<1x8x128xf32> to vector<8x128xf32>
    %205 = vector.shape_cast %201 : vector<8x128xf32> to vector<1x8x128xf32>
    tpu.vector_store %arg3[%202, %c0_52, %c0_53], %205 {strides = array<i32>} : memref<8x8x128xf32, #tpu.memory_space<vmem>>, vector<1x8x128xf32>,
    %c8_i32 = arith.constant 8 : i32
    %c0_54 = arith.constant 0 : index
    %c0_55 = arith.constant 0 : index
    %206 = vector.load %arg4[%c0_54, %c0_55] : memref<8x128xf32, #tpu.memory_space<vmem>>, vector<8x128xf32>
    tpu.vector_store %arg4[%c0_54, %c0_55], %201 {strides = array<i32>} : memref<8x128xf32, #tpu.memory_space<vmem>>, vector<8x128xf32>,
    %c0_56 = arith.constant 0 : index
    %c0_57 = arith.constant 0 : index
    %207 = vector.load %arg5[%c0_56, %c0_57] : memref<8x128xf32, #tpu.memory_space<vmem>>, vector<8x128xf32>
    tpu.vector_store %arg5[%c0_56, %c0_57], %199 {strides = array<i32>} : memref<8x128xf32, #tpu.memory_space<vmem>>, vector<8x128xf32>,
    return
  }
  func.func @transform_0(%arg0: i32) -> (i32, i32, i32) {
    %c0_i32 = arith.constant 0 : i32
    %c0_i32_0 = arith.constant 0 : i32
    %c0_i32_1 = arith.constant 0 : i32
    return %arg0, %c0_i32, %c0_i32_0 : i32, i32, i32
  }
  func.func @transform_1(%arg0: i32) -> (i32, i32) {
    %c0_i32 = arith.constant 0 : i32
    %c0_i32_0 = arith.constant 0 : i32
    %c0_i32_1 = arith.constant 0 : i32
    return %c0_i32, %c0_i32_0 : i32, i32
  }
  func.func @transform_2(%arg0: i32) -> (i32, i32, i32) {
    %c0_i32 = arith.constant 0 : i32
    %c0_i32_0 = arith.constant 0 : i32
    %c0_i32_1 = arith.constant 0 : i32
    return %arg0, %c0_i32, %c0_i32_0 : i32, i32, i32
  }
}

</mosaic_0001>

<bundles_post_ra>
// kernel: recurrent_modal_module.2
= control target key start
LH: loop header
LB: loop body
LE: loop exit
PB: predicated region body
PF: predicated region fallthrough
CT: control target
= control target key end

     0   :  { %7 = vsyncpa [#allocation5], 0  ;;  %s2711_s0 = inlined_call_operand.hbm [shape: f32[8,8,512], index: 0, kind: input, shape index: {}]   ;;  %s2712_s1 = inlined_call_operand.hbm [shape: f32[128,512], index: 1, kind: input, shape index: {}]   ;;  %s2713_s2 = inlined_call_operand.hbm [shape: f32[8,8,128], index: 2, kind: output, shape index: {}]  }
   0x1   :  { %8 = vsyncpa [#allocation8], 0 }
   0x2   :  { %9 = vsyncpa [#allocation6], 0  ;;  %s2290_s9 = smov [#allocation4]   ;;  %s2218_s13 = scalar_lea.hbm %s2711_s0, 4096 }
   0x3   :  { %s15_s10 = sshll.u32 %s2290_s9, 4  ;;  %p2219_p0 = scmp.ne.s32.totalorder %s2711_s0, %s2218_s13  ;;  %s16_s10 = int_to_ptr.vmem [resolvable:$true] %s15_s10 }
   0x4   :  { %p2222_p1 = scmp.lt.u32.totalorder %s2218_s13, %s2711_s0 }
   0x6   :  { %p2224_p2 = pnand %p2222_p1, %p2219_p0 }
   0x8   :  { %2227 = shalt.err (!%p2224_p2)
}
   0x9   :  { %s2228_s18 = scalar_lea.vmem %s16_s10, 4096  ;;  %p2233_p4 = scmp.lt.s32.totalorder %s16_s10, %s16_s10 }
   0xa   :  { %p2229_p3 = scmp.ne.s32.totalorder %s16_s10, %s2228_s18  ;;  %p2234_p5 = scmp.lt.s32.totalorder %s2228_s18, %s2228_s18 }
   0xc   :  { %p2235_p6 = por %p2234_p5, %p2233_p4 }
   0xe   :  { %p2236_p7 = pnand %p2235_p6, %p2229_p3 }
  0x10   :  { %2239 = shalt.err (!%p2236_p7)
}
  0x11   :  { %s2291_s19 = smov 512   ;;  %s2292_s20 = smov 32  }
  0x12   :  { %21 = dma.hbm_to_vmem [thread:$0]  %s2711_s0, 4096, %s16_s10, [#allocation5], %s2291_s19, %s2291_s19, %s2292_s20  }
  0x13   :  { %s2293_s23 = smov [#allocation7]   ;;  %s2240_s27 = scalar_lea.hbm %s2712_s1, 8192 }
  0x14   :  { %s27_s24 = sshll.u32 %s2293_s23, 4  ;;  %p2241_p8 = scmp.ne.s32.totalorder %s2712_s1, %s2240_s27  ;;  %s28_s24 = int_to_ptr.vmem [resolvable:$true] %s27_s24 }
  0x15   :  { %p2244_p9 = scmp.lt.u32.totalorder %s2240_s27, %s2712_s1 }
  0x17   :  { %p2246_p10 = pnand %p2244_p9, %p2241_p8 }
  0x19   :  { %2249 = shalt.err (!%p2246_p10)
}
  0x1a   :  { %s2250_s4 = scalar_lea.vmem %s28_s24, 8192  ;;  %p2255_p12 = scmp.lt.s32.totalorder %s28_s24, %s28_s24 }
  0x1b   :  { %p2251_p11 = scmp.ne.s32.totalorder %s28_s24, %s2250_s4  ;;  %p2256_p13 = scmp.lt.s32.totalorder %s2250_s4, %s2250_s4 }
  0x1d   :  { %p2257_p0 = por %p2256_p13, %p2255_p12 }
  0x1f   :  { %p2258_p1 = pnand %p2257_p0, %p2251_p11 }
  0x21   :  { %2261 = shalt.err (!%p2258_p1)
}
  0x22   :  { %33 = dma.hbm_to_vmem [thread:$0]  %s2712_s1, 8192, %s28_s24, [#allocation8], %s2291_s19, %s2291_s19, %s2292_s20  }
  0x23   :  { %2284 = dma.done.wait [#allocation5], 4096  }
  0x24   :  { %2285 = vsyncadd [#allocation5], 4294963200 }
  0x25   :  { %2286 = dma.done.wait [#allocation8], 8192  }
  0x26   :  { %2287 = vsyncadd [#allocation8], 4294959104  ;;  %v2294_v0 = vmov 0.0   ;;  %v47_v1 = vld [vmem:[#allocation7 + $0x8] sm:$0xff]  ;;  %v46_v3 = vld [vmem:[#allocation7] sm:$0xff]  ;;  %s2295_s1 = smov [#allocation9]  }
  0x27   :  { %180 = vmatprep.mubr.f32.mxu0 %v2294_v0  ;;  %251 = vmatprep.mubr.f32.mxu1 %v2294_v0  ;;  %v51_v2 = vld [vmem:[#allocation7 + $0x28] sm:$0xff]  ;;  %v50_v5 = vld [vmem:[#allocation7 + $0x20] sm:$0xff]  ;;  %v49_v19 = vld [vmem:[#allocation7 + $0x18] sm:$0xff]  ;;  %s1533_s6 = sshll.u32 %s2295_s1, 4  ;;  %s1534_s6 = int_to_ptr.vmem [resolvable:$true] %s1533_s6 }
  0x28   :  { %v2339_v4 = vpack.c.bf16 %v51_v2, %v47_v1  ;;  %v55_v6 = vld [vmem:[#allocation7 + $0x48] sm:$0xff]  ;;  %v2341_v8 = vpack.c.bf16 %v50_v5, %v46_v3  ;;  %v54_v10 = vld [vmem:[#allocation7 + $0x40] sm:$0xff]  ;;  %v53_v20 = vld [vmem:[#allocation7 + $0x38] sm:$0xff]  ;;  %s2262_s7 = scalar_lea.vmem %s1534_s6, 1024  ;;  %p2267_p3 = scmp.lt.s32.totalorder %s1534_s6, %s1534_s6 }
  0x29   :  { %v59_v7 = vld [vmem:[#allocation7 + $0x68] sm:$0xff]  ;;  %v58_v11 = vld [vmem:[#allocation7 + $0x60] sm:$0xff]  ;;  %v2352_v22 = vpack.c.bf16 %v53_v20, %v49_v19  ;;  %v48_v23 = vld [vmem:[#allocation7 + $0x10] sm:$0xff]  ;;  %p2263_p2 = scmp.ne.s32.totalorder %s1534_s6, %s2262_s7  ;;  %p2268_p4 = scmp.lt.s32.totalorder %s2262_s7, %s2262_s7 }
  0x2a   :  { %v2343_v9 = vpack.c.bf16 %v59_v7, %v55_v6  ;;  %v63_v12 = vld [vmem:[#allocation7 + $0x88] sm:$0xff]  ;;  %1571 = vmatprep.subr.bf16.mxu0 %v2339_v4  ;;  %v2347_v14 = vpack.c.bf16 %v58_v11, %v54_v10  ;;  %v62_v15 = vld [vmem:[#allocation7 + $0x80] sm:$0xff]  ;;  %v52_v24 = vld [vmem:[#allocation7 + $0x30] sm:$0xff] }
  0x2b   :  { %v67_v13 = vld [vmem:[#allocation7 + $0xa8] sm:$0xff]  ;;  %1573 = vmatpush1.bf16.msra.mxu0 %v2341_v8  ;;  %v66_v16 = vld [vmem:[#allocation7 + $0xa0] sm:$0xff]  ;;  %v2354_v25 = vpack.c.bf16 %v52_v24, %v48_v23  ;;  %1603 = vmatprep.subr.bf16.mxu1 %v2352_v22  ;;  %v57_v27 = vld [vmem:[#allocation7 + $0x58] sm:$0xff]  ;;  %p2269_p5 = por %p2268_p4, %p2267_p3 }
  0x2c   :  { %1575 = vmatprep.subr.bf16.mxu0 %v2343_v9  ;;  %v2350_v17 = vpack.c.bf16 %v67_v13, %v63_v12  ;;  %v71_v18 = vld [vmem:[#allocation7 + $0xc8] sm:$0xff]  ;;  %v2357_v26 = vpack.c.bf16 %v66_v16, %v62_v15  ;;  %v61_v28 = vld [vmem:[#allocation7 + $0x78] sm:$0xff]  ;;  %v56_v29 = vld [vmem:[#allocation7 + $0x50] sm:$0xff] }
  0x2d   :  { %v75_v21 = vld [vmem:[#allocation7 + $0xe8] sm:$0xff]  ;;  %v70_v31 = vld [vmem:[#allocation7 + $0xc0] sm:$0xff]  ;;  %1605 = vmatpush1.bf16.msra.mxu1 %v2354_v25  ;;  %v2364_v33 = vpack.c.bf16 %v61_v28, %v57_v27  ;;  %v60_v34 = vld [vmem:[#allocation7 + $0x70] sm:$0xff]  ;;  %p2270_p6 = pnand %p2269_p5, %p2263_p2 }
  0x2e   :  { %v2361_v30 = vpack.c.bf16 %v75_v21, %v71_v18  ;;  %v74_v32 = vld [vmem:[#allocation7 + $0xe0] sm:$0xff]  ;;  %v79_v35 = vld [vmem:[#allocation7 + $0x108] sm:$0xff]  ;;  %v2366_v37 = vpack.c.bf16 %v60_v34, %v56_v29  ;;  %v65_v38 = vld [vmem:[#allocation7 + $0x98] sm:$0xff] }
  0x2f   :  { %1577 = vmatpush1.bf16.msra.mxu0 %v2347_v14  ;;  %v83_v36 = vld [vmem:[#allocation7 + $0x128] sm:$0xff]  ;;  %1607 = vmatprep.subr.bf16.mxu1 %v2364_v33  ;;  %v69_v39 = vld [vmem:[#allocation7 + $0xb8] sm:$0xff]  ;;  %v64_v40 = vld [vmem:[#allocation7 + $0x90] sm:$0xff]  ;;  %v2370_v42 = vpack.c.bf16 %v74_v32, %v70_v31 }
  0x30   :  { %1579 = vmatprep.subr.bf16.mxu0 %v2350_v17  ;;  %v68_v41 = vld [vmem:[#allocation7 + $0xb0] sm:$0xff]  ;;  %v78_v43 = vld [vmem:[#allocation7 + $0x100] sm:$0xff]  ;;  %v2372_v45 = vpack.c.bf16 %v69_v39, %v65_v38  ;;  %v2375_v46 = vpack.c.bf16 %v83_v36, %v79_v35  ;;  %v87_v47 = vld [vmem:[#allocation7 + $0x148] sm:$0xff] }
  0x31   :  { %v82_v44 = vld [vmem:[#allocation7 + $0x120] sm:$0xff]  ;;  %1609 = vmatpush1.bf16.msra.mxu1 %v2366_v37  ;;  %v2378_v48 = vpack.c.bf16 %v68_v41, %v64_v40  ;;  %v73_v49 = vld [vmem:[#allocation7 + $0xd8] sm:$0xff]  ;;  %v91_v51 = vld [vmem:[#allocation7 + $0x168] sm:$0xff] }
  0x32   :  { %v77_v50 = vld [vmem:[#allocation7 + $0xf8] sm:$0xff]  ;;  %1611 = vmatprep.subr.bf16.mxu1 %v2372_v45  ;;  %v72_v53 = vld [vmem:[#allocation7 + $0xd0] sm:$0xff]  ;;  %v2384_v55 = vpack.c.bf16 %v82_v44, %v78_v43  ;;  %v2387_v58 = vpack.c.bf16 %v91_v51, %v87_v47  ;;  %v86_v59 = vld [vmem:[#allocation7 + $0x140] sm:$0xff] }
  0x33   :  { %1581 = vmatpush1.bf16.msra.mxu0 %v2357_v26  ;;  %v2381_v52 = vpack.c.bf16 %v77_v50, %v73_v49  ;;  %v76_v54 = vld [vmem:[#allocation7 + $0xf0] sm:$0xff]  ;;  %v81_v56 = vld [vmem:[#allocation7 + $0x118] sm:$0xff]  ;;  %v90_v60 = vld [vmem:[#allocation7 + $0x160] sm:$0xff] }
  0x34   :  { %1583 = vmatprep.subr.bf16.mxu0 %v2361_v30  ;;  %v85_v57 = vld [vmem:[#allocation7 + $0x138] sm:$0xff]  ;;  %v95_v61 = vld [vmem:[#allocation7 + $0x188] sm:$0xff]  ;;  %v2390_v62 = vpack.c.bf16 %v76_v54, %v72_v53  ;;  %v80_v2 = vld [vmem:[#allocation7 + $0x110] sm:$0xff]  ;;  %v2396_v7 = vpack.c.bf16 %v90_v60, %v86_v59 }
  0x35   :  { %1613 = vmatpush1.bf16.msra.mxu1 %v2378_v48  ;;  %v99_v63 = vld [vmem:[#allocation7 + $0x1a8] sm:$0xff]  ;;  %v2393_v1 = vpack.c.bf16 %v85_v57, %v81_v56  ;;  %v84_v3 = vld [vmem:[#allocation7 + $0x130] sm:$0xff]  ;;  %v89_v5 = vld [vmem:[#allocation7 + $0x158] sm:$0xff] }
  0x36   :  { %1615 = vmatprep.subr.bf16.mxu1 %v2381_v52  ;;  %v93_v6 = vld [vmem:[#allocation7 + $0x178] sm:$0xff]  ;;  %v2399_v10 = vpack.c.bf16 %v99_v63, %v95_v61  ;;  %v94_v11 = vld [vmem:[#allocation7 + $0x180] sm:$0xff]  ;;  %v103_v13 = vld [vmem:[#allocation7 + $0x1c8] sm:$0xff]  ;;  %v2402_v15 = vpack.c.bf16 %v84_v3, %v80_v2 }
  0x37   :  { %1585 = vmatpush1.bf16.msra.mxu0 %v2370_v42  ;;  %v98_v12 = vld [vmem:[#allocation7 + $0x1a0] sm:$0xff]  ;;  %v107_v16 = vld [vmem:[#allocation7 + $0x1e8] sm:$0xff]  ;;  %v2405_v18 = vpack.c.bf16 %v93_v6, %v89_v5  ;;  %v88_v19 = vld [vmem:[#allocation7 + $0x150] sm:$0xff] }
  0x38   :  { %1587 = vmatprep.subr.bf16.mxu0 %v2375_v46  ;;  %v92_v20 = vld [vmem:[#allocation7 + $0x170] sm:$0xff]  ;;  %v97_v21 = vld [vmem:[#allocation7 + $0x198] sm:$0xff]  ;;  %v2408_v24 = vpack.c.bf16 %v98_v12, %v94_v11  ;;  %v2411_v27 = vpack.c.bf16 %v107_v16, %v103_v13  ;;  %v102_v28 = vld [vmem:[#allocation7 + $0x1c0] sm:$0xff] }
  0x39   :  { %1617 = vmatpush1.bf16.msra.mxu1 %v2390_v62  ;;  %v101_v23 = vld [vmem:[#allocation7 + $0x1b8] sm:$0xff]  ;;  %v106_v29 = vld [vmem:[#allocation7 + $0x1e0] sm:$0xff]  ;;  %v2414_v31 = vpack.c.bf16 %v92_v20, %v88_v19  ;;  %v96_v34 = vld [vmem:[#allocation7 + $0x190] sm:$0xff] }
  0x3a   :  { %1619 = vmatprep.subr.bf16.mxu1 %v2393_v1  ;;  %v2417_v32 = vpack.c.bf16 %v101_v23, %v97_v21  ;;  %v100_v35 = vld [vmem:[#allocation7 + $0x1b0] sm:$0xff]  ;;  %v105_v36 = vld [vmem:[#allocation7 + $0x1d8] sm:$0xff]  ;;  %v2420_v39 = vpack.c.bf16 %v106_v29, %v102_v28  ;;  %v112_v49 = vld [vmem:[#allocation4] sm:$0xff] }
  0x3b   :  { %1589 = vmatpush1.bf16.msra.mxu0 %v2384_v55  ;;  %v109_v38 = vld [vmem:[#allocation7 + $0x1f8] sm:$0xff]  ;;  %v2424_v40 = vpack.c.bf16 %v100_v35, %v96_v34  ;;  %v104_v43 = vld [vmem:[#allocation7 + $0x1d0] sm:$0xff]  ;;  %v113_v50 = vld [vmem:[#allocation4 + $0x8] sm:$0xff] }
  0x3c   :  { %1591 = vmatprep.subr.bf16.mxu0 %v2387_v58  ;;  %v2427_v41 = vpack.c.bf16 %v109_v38, %v105_v36  ;;  %v108_v44 = vld [vmem:[#allocation7 + $0x1f0] sm:$0xff]  ;;  %v115_v3 = vld [vmem:[#allocation4 + $0x18] sm:$0xff] }
  0x3d   :  { %1621 = vmatpush1.bf16.msra.mxu1 %v2402_v15  ;;  %v2431_v47 = vpack.c.bf16 %v108_v44, %v104_v43  ;;  %v114_v60 = vld [vmem:[#allocation4 + $0x10] sm:$0xff]  ;;  %v288_v44 = vld [vmem:[#allocation4 + $0x20] sm:$0xff] }
  0x3e   :  { %1623 = vmatprep.subr.bf16.mxu1 %v2405_v18 }
  0x3f   :  { %1593 = vmatpush1.bf16.msra.mxu0 %v2396_v7 }
  0x40   :  { %1595 = vmatprep.subr.bf16.mxu0 %v2399_v10 }
  0x41   :  { %1625 = vmatpush1.bf16.msra.mxu1 %v2414_v31 }
  0x42   :  { %1627 = vmatprep.subr.bf16.mxu1 %v2417_v32 }
  0x43   :  { %1597 = vmatpush1.bf16.msra.mxu0 %v2408_v24 }
  0x44   :  { %1599 = vmatprep.subr.bf16.mxu0 %v2411_v27 }
  0x45   :  { %1629 = vmatpush1.bf16.msra.mxu1 %v2424_v40 }
  0x46   :  { %1631 = vmatprep.subr.bf16.mxu1 %v2427_v41 }
  0x47   :  { %1601 = vmatpush1.bf16.msra.mxu0 %v2420_v39 }
  0x48   :  { %1635 = vmatprep.subr.bf16.mxu0 %v2339_v4 }
  0x49   :  { %1633 = vmatpush1.bf16.msra.mxu1 %v2431_v47 }
  0x4a   :  { %181 = vmatmul.mubr.f32.vlgmr.msra.gmra.mrb[0].mxu0 %v2294_v0  ;;  %1667 = vmatprep.subr.bf16.mxu1 %v2352_v22 }
  0x4b   :  { %1637 = vmatpush1.bf16.msra.mxu0 %v2341_v8  ;;  %356 = vmatprep.mubr.f32.mxu0 %v2294_v0 }
  0x4c   :  { %1639 = vmatprep.subr.bf16.mxu0 %v2343_v9  ;;  %252 = vmatmul.mubr.f32.vlgmr.msra.gmra.mrb[0].mxu1 %v2294_v0 }
  0x4d   :  { %1669 = vmatpush1.bf16.msra.mxu1 %v2354_v25  ;;  %427 = vmatprep.mubr.f32.mxu1 %v2294_v0 }
  0x4e   :  { %1671 = vmatprep.subr.bf16.mxu1 %v2364_v33 }
  0x4f   :  { %1641 = vmatpush1.bf16.msra.mxu0 %v2347_v14 }
  0x50   :  { %1643 = vmatprep.subr.bf16.mxu0 %v2350_v17 }
  0x51   :  { %1673 = vmatpush1.bf16.msra.mxu1 %v2366_v37 }
  0x52   :  { %1675 = vmatprep.subr.bf16.mxu1 %v2372_v45 }
  0x53   :  { %1645 = vmatpush1.bf16.msra.mxu0 %v2357_v26 }
  0x54   :  { %1647 = vmatprep.subr.bf16.mxu0 %v2361_v30 }
  0x55   :  { %1677 = vmatpush1.bf16.msra.mxu1 %v2378_v48 }
  0x56   :  { %1679 = vmatprep.subr.bf16.mxu1 %v2381_v52 }
  0x57   :  { %1649 = vmatpush1.bf16.msra.mxu0 %v2370_v42 }
  0x58   :  { %1651 = vmatprep.subr.bf16.mxu0 %v2375_v46 }
  0x59   :  { %1681 = vmatpush1.bf16.msra.mxu1 %v2390_v62 }
  0x5a   :  { %1683 = vmatprep.subr.bf16.mxu1 %v2393_v1 }
  0x5b   :  { %1653 = vmatpush1.bf16.msra.mxu0 %v2384_v55 }
  0x5c   :  { %1655 = vmatprep.subr.bf16.mxu0 %v2387_v58 }
  0x5d   :  { %1685 = vmatpush1.bf16.msra.mxu1 %v2402_v15 }
  0x5e   :  { %1687 = vmatprep.subr.bf16.mxu1 %v2405_v18 }
  0x5f   :  { %1657 = vmatpush1.bf16.msra.mxu0 %v2396_v7 }
  0x60   :  { %1659 = vmatprep.subr.bf16.mxu0 %v2399_v10 }
  0x61   :  { %1689 = vmatpush1.bf16.msra.mxu1 %v2414_v31 }
  0x62   :  { %1691 = vmatprep.subr.bf16.mxu1 %v2417_v32 }
  0x63   :  { %1661 = vmatpush1.bf16.msra.mxu0 %v2408_v24 }
  0x64   :  { %1663 = vmatprep.subr.bf16.mxu0 %v2411_v27 }
  0x65   :  { %1693 = vmatpush1.bf16.msra.mxu1 %v2424_v40 }
  0x66   :  { %1695 = vmatprep.subr.bf16.mxu1 %v2427_v41 }
  0x67   :  { %1665 = vmatpush1.bf16.msra.mxu0 %v2420_v39 }
  0x68   :  { %1699 = vmatprep.subr.bf16.mxu0 %v2339_v4 }
  0x69   :  { %1697 = vmatpush1.bf16.msra.mxu1 %v2431_v47 }
  0x6a   :  { %1731 = vmatprep.subr.bf16.mxu1 %v2352_v22 }
 0x11d   :  { %v182_v51 = vpop.f32.mrb[0].mxu0 }
 0x11e   :  { %v258_v53 = vadd.f32 %v182_v51, %v112_v49  ;;  %v184_v54 = vpop.f32.mrb[1].mxu0  ;;  %v289_v49 = vld [vmem:[#allocation4 + $0x28] sm:$0xff] }
 0x11f   :  { %v259_v56 = vadd.f32 %v184_v54, %v113_v50  ;;  %v253_v61 = vpop.f32.mrb[0].mxu1 }
 0x120   :  { %v1546_v57 = vmul.f32 -1.442695, %v258_v53  ;;  %v255_v63 = vpop.f32.mrb[1].mxu1  ;;  %v260_v2 = vadd.f32 %v253_v61, %v114_v60  ;;  %v290_v61 = vld [vmem:[#allocation4 + $0x30] sm:$0xff] }
 0x121   :  { %v1547_v59 = vmul.f32 -1.442695, %v259_v56  ;;  %v261_v6 = vadd.f32 %v255_v63, %v115_v3 }
 0x122   :  { %2090 = vpow2.f32 %v1546_v57  ;;  %v1548_v5 = vmul.f32 -1.442695, %v260_v2  ;;  %v291_v2 = vld [vmem:[#allocation4 + $0x38] sm:$0xff] }
 0x123   :  { %2092 = vpow2.f32 %v1547_v59 }
 0x124   :  { %2094 = vpow2.f32 %v1548_v5 }
 0x125   :  { %2096 = vtanh.f32 %v261_v6 }
 0x12c   :  { %v2091_v11 = vpop.eup %2090 }
 0x12d   :  { %v2093_v12 = vpop.eup %2092  ;;  %v271_v13 = vadd.f32 1.0, %v2091_v11 }
 0x12e   :  { %v272_v16 = vadd.f32 1.0, %v2093_v12  ;;  %v2095_v19 = vpop.eup %2094 }
 0x12f   :  { %2098 = vrcp.f32 %v271_v13  ;;  %v2097_v20 = vpop.eup %2096  ;;  %v273_v23 = vadd.f32 1.0, %v2095_v19 }
 0x130   :  { %2100 = vrcp.f32 %v272_v16 }
 0x131   :  { %2102 = vrcp.f32 %v273_v23 }
 0x139   :  { %v2099_v21 = vpop.eup %2098 }
 0x13a   :  { %v2101_v28 = vpop.eup %2100  ;;  %v282_v29 = vmul.f32 %v2099_v21, %v2097_v20 }
 0x13b   :  { %v281_v34 = vmul.f32 0.0, %v2101_v28  ;;  %v2103_v36 = vpop.eup %2102 }
 0x13d   :  { %v2473_v35 = vadd.f32 %v282_v29, %v281_v34 }
 0x13f   :  { %2104 = vtanh.f32 %v2473_v35 }
 0x149   :  { %v2105_v38 = vpop.eup %2104 }
 0x14a   :  { %v285_v43 = vmul.f32 %v2105_v38, %v2103_v36 }
 0x14c   :  { %286 = vst [vmem:[#allocation9] sm:$0xff] %v285_v43  ;;  %357 = vmatmul.mubr.f32.vlgmr.msra.gmra.mrb[2].mxu0 %v285_v43  ;;  %428 = vmatmul.mubr.f32.vlgmr.msra.gmra.mrb[2].mxu1 %v285_v43 }
 0x14d   :  { %1701 = vmatpush1.bf16.msra.mxu0 %v2341_v8  ;;  %1733 = vmatpush1.bf16.msra.mxu1 %v2354_v25 }
 0x14e   :  { %1703 = vmatprep.subr.bf16.mxu0 %v2343_v9  ;;  %1735 = vmatprep.subr.bf16.mxu1 %v2364_v33 }
 0x14f   :  { %533 = vmatprep.mubr.f32.mxu0 %v2294_v0  ;;  %604 = vmatprep.mubr.f32.mxu1 %v2294_v0 }
 0x151   :  { %1705 = vmatpush1.bf16.msra.mxu0 %v2347_v14  ;;  %1737 = vmatpush1.bf16.msra.mxu1 %v2366_v37 }
 0x152   :  { %1707 = vmatprep.subr.bf16.mxu0 %v2350_v17  ;;  %1739 = vmatprep.subr.bf16.mxu1 %v2372_v45 }
 0x155   :  { %1709 = vmatpush1.bf16.msra.mxu0 %v2357_v26  ;;  %1741 = vmatpush1.bf16.msra.mxu1 %v2378_v48 }
 0x156   :  { %1711 = vmatprep.subr.bf16.mxu0 %v2361_v30  ;;  %1743 = vmatprep.subr.bf16.mxu1 %v2381_v52 }
 0x159   :  { %1713 = vmatpush1.bf16.msra.mxu0 %v2370_v42  ;;  %1745 = vmatpush1.bf16.msra.mxu1 %v2390_v62 }
 0x15a   :  { %1715 = vmatprep.subr.bf16.mxu0 %v2375_v46  ;;  %1747 = vmatprep.subr.bf16.mxu1 %v2393_v1 }
 0x15d   :  { %1717 = vmatpush1.bf16.msra.mxu0 %v2384_v55  ;;  %1749 = vmatpush1.bf16.msra.mxu1 %v2402_v15 }
 0x15e   :  { %1719 = vmatprep.subr.bf16.mxu0 %v2387_v58  ;;  %1751 = vmatprep.subr.bf16.mxu1 %v2405_v18 }
 0x161   :  { %1721 = vmatpush1.bf16.msra.mxu0 %v2396_v7  ;;  %1753 = vmatpush1.bf16.msra.mxu1 %v2414_v31 }
 0x162   :  { %1723 = vmatprep.subr.bf16.mxu0 %v2399_v10  ;;  %1755 = vmatprep.subr.bf16.mxu1 %v2417_v32 }
 0x165   :  { %1725 = vmatpush1.bf16.msra.mxu0 %v2408_v24  ;;  %1757 = vmatpush1.bf16.msra.mxu1 %v2424_v40 }
 0x166   :  { %1727 = vmatprep.subr.bf16.mxu0 %v2411_v27  ;;  %1759 = vmatprep.subr.bf16.mxu1 %v2427_v41 }
 0x169   :  { %1729 = vmatpush1.bf16.msra.mxu0 %v2420_v39  ;;  %1761 = vmatpush1.bf16.msra.mxu1 %v2431_v47 }
 0x16a   :  { %1763 = vmatprep.subr.bf16.mxu0 %v2339_v4  ;;  %1795 = vmatprep.subr.bf16.mxu1 %v2352_v22 }
 0x21f   :  { %v358_v50 = vpop.f32.mrb[2].mxu0  ;;  %v429_v51 = vpop.f32.mrb[2].mxu1 }
 0x220   :  { %v434_v53 = vadd.f32 %v358_v50, %v288_v44  ;;  %v360_v54 = vpop.f32.mrb[3].mxu0  ;;  %v431_v56 = vpop.f32.mrb[3].mxu1  ;;  %v436_v63 = vadd.f32 %v429_v51, %v290_v61  ;;  %v466_v44 = vld [vmem:[#allocation4 + $0x48] sm:$0xff] }
 0x221   :  { %v435_v57 = vadd.f32 %v360_v54, %v289_v49  ;;  %v437_v3 = vadd.f32 %v431_v56, %v291_v2 }
 0x222   :  { %v1549_v59 = vmul.f32 -1.442695, %v434_v53  ;;  %v1551_v5 = vmul.f32 -1.442695, %v436_v63  ;;  %v468_v63 = vld [vmem:[#allocation4 + $0x58] sm:$0xff] }
 0x223   :  { %v1550_v60 = vmul.f32 -1.442695, %v435_v57 }
 0x224   :  { %2106 = vpow2.f32 %v1549_v59 }
 0x225   :  { %2108 = vpow2.f32 %v1550_v60  ;;  %v467_v60 = vld [vmem:[#allocation4 + $0x50] sm:$0xff] }
 0x226   :  { %2110 = vtanh.f32 %v437_v3 }
 0x227   :  { %2112 = vpow2.f32 %v1551_v5 }
 0x22e   :  { %v2107_v6 = vpop.eup %2106 }
 0x22f   :  { %v447_v11 = vadd.f32 1.0, %v2107_v6  ;;  %v2109_v12 = vpop.eup %2108 }
 0x230   :  { %v448_v13 = vadd.f32 1.0, %v2109_v12  ;;  %v2111_v16 = vpop.eup %2110 }
 0x231   :  { %2114 = vrcp.f32 %v447_v11  ;;  %v2113_v19 = vpop.eup %2112 }
 0x232   :  { %2116 = vrcp.f32 %v448_v13  ;;  %v449_v28 = vadd.f32 1.0, %v2113_v19 }
 0x234   :  { %2118 = vrcp.f32 %v449_v28 }
 0x23b   :  { %v2115_v20 = vpop.eup %2114 }
 0x23c   :  { %v458_v21 = vmul.f32 %v2115_v20, %v2111_v16  ;;  %v2117_v23 = vpop.eup %2116 }
 0x23d   :  { %v457_v29 = vmul.f32 %v2117_v23, %v2473_v35  ;;  %v465_v35 = vld [vmem:[#allocation4 + $0x40] sm:$0xff] }
 0x23e   :  { %v2119_v36 = vpop.eup %2118 }
 0x23f   :  { %v2511_v34 = vadd.f32 %v458_v21, %v457_v29 }
 0x241   :  { %2120 = vtanh.f32 %v2511_v34 }
 0x24b   :  { %v2121_v38 = vpop.eup %2120 }
 0x24c   :  { %v461_v43 = vmul.f32 %v2121_v38, %v2119_v36 }
 0x24e   :  { %463 = vst [vmem:[#allocation9 + $0x8] sm:$0xff] %v461_v43  ;;  %534 = vmatmul.mubr.f32.vlgmr.msra.gmra.mrb[4].mxu0 %v461_v43  ;;  %605 = vmatmul.mubr.f32.vlgmr.msra.gmra.mrb[4].mxu1 %v461_v43 }
 0x24f   :  { %1765 = vmatpush1.bf16.msra.mxu0 %v2341_v8  ;;  %1797 = vmatpush1.bf16.msra.mxu1 %v2354_v25 }
 0x250   :  { %1767 = vmatprep.subr.bf16.mxu0 %v2343_v9  ;;  %1799 = vmatprep.subr.bf16.mxu1 %v2364_v33 }
 0x251   :  { %710 = vmatprep.mubr.f32.mxu0 %v2294_v0  ;;  %781 = vmatprep.mubr.f32.mxu1 %v2294_v0 }
 0x253   :  { %1769 = vmatpush1.bf16.msra.mxu0 %v2347_v14  ;;  %1801 = vmatpush1.bf16.msra.mxu1 %v2366_v37 }
 0x254   :  { %1771 = vmatprep.subr.bf16.mxu0 %v2350_v17  ;;  %1803 = vmatprep.subr.bf16.mxu1 %v2372_v45 }
 0x257   :  { %1773 = vmatpush1.bf16.msra.mxu0 %v2357_v26  ;;  %1805 = vmatpush1.bf16.msra.mxu1 %v2378_v48 }
 0x258   :  { %1775 = vmatprep.subr.bf16.mxu0 %v2361_v30  ;;  %1807 = vmatprep.subr.bf16.mxu1 %v2381_v52 }
 0x25b   :  { %1777 = vmatpush1.bf16.msra.mxu0 %v2370_v42  ;;  %1809 = vmatpush1.bf16.msra.mxu1 %v2390_v62 }
 0x25c   :  { %1779 = vmatprep.subr.bf16.mxu0 %v2375_v46  ;;  %1811 = vmatprep.subr.bf16.mxu1 %v2393_v1 }
 0x25f   :  { %1781 = vmatpush1.bf16.msra.mxu0 %v2384_v55  ;;  %1813 = vmatpush1.bf16.msra.mxu1 %v2402_v15 }
 0x260   :  { %1783 = vmatprep.subr.bf16.mxu0 %v2387_v58  ;;  %1815 = vmatprep.subr.bf16.mxu1 %v2405_v18 }
 0x263   :  { %1785 = vmatpush1.bf16.msra.mxu0 %v2396_v7  ;;  %1817 = vmatpush1.bf16.msra.mxu1 %v2414_v31 }
 0x264   :  { %1787 = vmatprep.subr.bf16.mxu0 %v2399_v10  ;;  %1819 = vmatprep.subr.bf16.mxu1 %v2417_v32 }
 0x267   :  { %1789 = vmatpush1.bf16.msra.mxu0 %v2408_v24  ;;  %1821 = vmatpush1.bf16.msra.mxu1 %v2424_v40 }
 0x268   :  { %1791 = vmatprep.subr.bf16.mxu0 %v2411_v27  ;;  %1823 = vmatprep.subr.bf16.mxu1 %v2427_v41 }
 0x26b   :  { %1793 = vmatpush1.bf16.msra.mxu0 %v2420_v39  ;;  %1825 = vmatpush1.bf16.msra.mxu1 %v2431_v47 }
 0x26c   :  { %1827 = vmatprep.subr.bf16.mxu0 %v2339_v4  ;;  %1859 = vmatprep.subr.bf16.mxu1 %v2352_v22 }
 0x321   :  { %v535_v49 = vpop.f32.mrb[4].mxu0  ;;  %v606_v50 = vpop.f32.mrb[4].mxu1 }
 0x322   :  { %v611_v51 = vadd.f32 %v535_v49, %v465_v35  ;;  %v537_v53 = vpop.f32.mrb[5].mxu0  ;;  %v608_v54 = vpop.f32.mrb[5].mxu1  ;;  %v613_v61 = vadd.f32 %v606_v50, %v467_v60  ;;  %v643_v35 = vld [vmem:[#allocation4 + $0x68] sm:$0xff] }
 0x323   :  { %v612_v56 = vadd.f32 %v537_v53, %v466_v44  ;;  %v614_v2 = vadd.f32 %v608_v54, %v468_v63 }
 0x324   :  { %v1552_v57 = vmul.f32 -1.442695, %v611_v51  ;;  %v1554_v3 = vmul.f32 -1.442695, %v613_v61  ;;  %v645_v61 = vld [vmem:[#allocation4 + $0x78] sm:$0xff] }
 0x325   :  { %v1553_v59 = vmul.f32 -1.442695, %v612_v56 }
 0x326   :  { %2122 = vpow2.f32 %v1552_v57 }
 0x327   :  { %2124 = vpow2.f32 %v1553_v59  ;;  %v644_v59 = vld [vmem:[#allocation4 + $0x70] sm:$0xff] }
 0x328   :  { %2126 = vtanh.f32 %v614_v2 }
 0x329   :  { %2128 = vpow2.f32 %v1554_v3 }
 0x330   :  { %v2123_v5 = vpop.eup %2122 }
 0x331   :  { %v624_v6 = vadd.f32 1.0, %v2123_v5  ;;  %v2125_v11 = vpop.eup %2124 }
 0x332   :  { %v625_v12 = vadd.f32 1.0, %v2125_v11  ;;  %v2127_v13 = vpop.eup %2126 }
 0x333   :  { %2130 = vrcp.f32 %v624_v6  ;;  %v2129_v16 = vpop.eup %2128 }
 0x334   :  { %2132 = vrcp.f32 %v625_v12  ;;  %v626_v23 = vadd.f32 1.0, %v2129_v16 }
 0x336   :  { %2134 = vrcp.f32 %v626_v23 }
 0x33d   :  { %v2131_v19 = vpop.eup %2130 }
 0x33e   :  { %v635_v20 = vmul.f32 %v2131_v19, %v2127_v13  ;;  %v2133_v21 = vpop.eup %2132 }
 0x33f   :  { %v634_v28 = vmul.f32 %v2133_v21, %v2511_v34  ;;  %v642_v34 = vld [vmem:[#allocation4 + $0x60] sm:$0xff] }
 0x340   :  { %v2135_v36 = vpop.eup %2134 }
 0x341   :  { %v2549_v29 = vadd.f32 %v635_v20, %v634_v28 }
 0x343   :  { %2136 = vtanh.f32 %v2549_v29 }
 0x34d   :  { %v2137_v38 = vpop.eup %2136 }
 0x34e   :  { %v638_v43 = vmul.f32 %v2137_v38, %v2135_v36 }
 0x350   :  { %640 = vst [vmem:[#allocation9 + $0x10] sm:$0xff] %v638_v43  ;;  %711 = vmatmul.mubr.f32.vlgmr.msra.gmra.mrb[6].mxu0 %v638_v43  ;;  %782 = vmatmul.mubr.f32.vlgmr.msra.gmra.mrb[6].mxu1 %v638_v43 }
 0x351   :  { %1829 = vmatpush1.bf16.msra.mxu0 %v2341_v8  ;;  %1861 = vmatpush1.bf16.msra.mxu1 %v2354_v25 }
 0x352   :  { %1831 = vmatprep.subr.bf16.mxu0 %v2343_v9  ;;  %1863 = vmatprep.subr.bf16.mxu1 %v2364_v33 }
 0x353   :  { %887 = vmatprep.mubr.f32.mxu0 %v2294_v0  ;;  %958 = vmatprep.mubr.f32.mxu1 %v2294_v0 }
 0x355   :  { %1833 = vmatpush1.bf16.msra.mxu0 %v2347_v14  ;;  %1865 = vmatpush1.bf16.msra.mxu1 %v2366_v37 }
 0x356   :  { %1835 = vmatprep.subr.bf16.mxu0 %v2350_v17  ;;  %1867 = vmatprep.subr.bf16.mxu1 %v2372_v45 }
 0x359   :  { %1837 = vmatpush1.bf16.msra.mxu0 %v2357_v26  ;;  %1869 = vmatpush1.bf16.msra.mxu1 %v2378_v48 }
 0x35a   :  { %1839 = vmatprep.subr.bf16.mxu0 %v2361_v30  ;;  %1871 = vmatprep.subr.bf16.mxu1 %v2381_v52 }
 0x35d   :  { %1841 = vmatpush1.bf16.msra.mxu0 %v2370_v42  ;;  %1873 = vmatpush1.bf16.msra.mxu1 %v2390_v62 }
 0x35e   :  { %1843 = vmatprep.subr.bf16.mxu0 %v2375_v46  ;;  %1875 = vmatprep.subr.bf16.mxu1 %v2393_v1 }
 0x361   :  { %1845 = vmatpush1.bf16.msra.mxu0 %v2384_v55  ;;  %1877 = vmatpush1.bf16.msra.mxu1 %v2402_v15 }
 0x362   :  { %1847 = vmatprep.subr.bf16.mxu0 %v2387_v58  ;;  %1879 = vmatprep.subr.bf16.mxu1 %v2405_v18 }
 0x365   :  { %1849 = vmatpush1.bf16.msra.mxu0 %v2396_v7  ;;  %1881 = vmatpush1.bf16.msra.mxu1 %v2414_v31 }
 0x366   :  { %1851 = vmatprep.subr.bf16.mxu0 %v2399_v10  ;;  %1883 = vmatprep.subr.bf16.mxu1 %v2417_v32 }
 0x369   :  { %1853 = vmatpush1.bf16.msra.mxu0 %v2408_v24  ;;  %1885 = vmatpush1.bf16.msra.mxu1 %v2424_v40 }
 0x36a   :  { %1855 = vmatprep.subr.bf16.mxu0 %v2411_v27  ;;  %1887 = vmatprep.subr.bf16.mxu1 %v2427_v41 }
 0x36d   :  { %1857 = vmatpush1.bf16.msra.mxu0 %v2420_v39  ;;  %1889 = vmatpush1.bf16.msra.mxu1 %v2431_v47 }
 0x36e   :  { %1891 = vmatprep.subr.bf16.mxu0 %v2339_v4  ;;  %1923 = vmatprep.subr.bf16.mxu1 %v2352_v22 }
 0x423   :  { %v712_v44 = vpop.f32.mrb[6].mxu0  ;;  %v783_v49 = vpop.f32.mrb[6].mxu1 }
 0x424   :  { %v788_v50 = vadd.f32 %v712_v44, %v642_v34  ;;  %v714_v51 = vpop.f32.mrb[7].mxu0  ;;  %v785_v53 = vpop.f32.mrb[7].mxu1  ;;  %v790_v60 = vadd.f32 %v783_v49, %v644_v59  ;;  %v820_v34 = vld [vmem:[#allocation4 + $0x88] sm:$0xff] }
 0x425   :  { %v789_v54 = vadd.f32 %v714_v51, %v643_v35  ;;  %v791_v63 = vadd.f32 %v785_v53, %v645_v61 }
 0x426   :  { %v1555_v56 = vmul.f32 -1.442695, %v788_v50  ;;  %v1557_v2 = vmul.f32 -1.442695, %v790_v60  ;;  %v822_v60 = vld [vmem:[#allocation4 + $0x98] sm:$0xff] }
 0x427   :  { %v1556_v57 = vmul.f32 -1.442695, %v789_v54 }
 0x428   :  { %2138 = vpow2.f32 %v1555_v56 }
 0x429   :  { %2140 = vpow2.f32 %v1556_v57  ;;  %v821_v57 = vld [vmem:[#allocation4 + $0x90] sm:$0xff] }
 0x42a   :  { %2142 = vtanh.f32 %v791_v63 }
 0x42b   :  { %2144 = vpow2.f32 %v1557_v2 }
 0x432   :  { %v2139_v3 = vpop.eup %2138 }
 0x433   :  { %v801_v5 = vadd.f32 1.0, %v2139_v3  ;;  %v2141_v6 = vpop.eup %2140 }
 0x434   :  { %v802_v11 = vadd.f32 1.0, %v2141_v6  ;;  %v2143_v12 = vpop.eup %2142 }
 0x435   :  { %2146 = vrcp.f32 %v801_v5  ;;  %v2145_v13 = vpop.eup %2144 }
 0x436   :  { %2148 = vrcp.f32 %v802_v11  ;;  %v803_v21 = vadd.f32 1.0, %v2145_v13 }
 0x438   :  { %2150 = vrcp.f32 %v803_v21 }
 0x43f   :  { %v2147_v16 = vpop.eup %2146 }
 0x440   :  { %v812_v19 = vmul.f32 %v2147_v16, %v2143_v12  ;;  %v2149_v20 = vpop.eup %2148 }
 0x441   :  { %v811_v23 = vmul.f32 %v2149_v20, %v2549_v29  ;;  %v819_v29 = vld [vmem:[#allocation4 + $0x80] sm:$0xff] }
 0x442   :  { %v2151_v36 = vpop.eup %2150 }
 0x443   :  { %v2587_v28 = vadd.f32 %v812_v19, %v811_v23 }
 0x445   :  { %2152 = vtanh.f32 %v2587_v28 }
 0x44f   :  { %v2153_v38 = vpop.eup %2152 }
 0x450   :  { %v815_v43 = vmul.f32 %v2153_v38, %v2151_v36 }
 0x452   :  { %817 = vst [vmem:[#allocation9 + $0x18] sm:$0xff] %v815_v43  ;;  %888 = vmatmul.mubr.f32.vlgmr.msra.gmra.mrb[8].mxu0 %v815_v43  ;;  %959 = vmatmul.mubr.f32.vlgmr.msra.gmra.mrb[8].mxu1 %v815_v43 }
 0x453   :  { %1893 = vmatpush1.bf16.msra.mxu0 %v2341_v8  ;;  %1925 = vmatpush1.bf16.msra.mxu1 %v2354_v25 }
 0x454   :  { %1895 = vmatprep.subr.bf16.mxu0 %v2343_v9  ;;  %1927 = vmatprep.subr.bf16.mxu1 %v2364_v33 }
 0x455   :  { %1064 = vmatprep.mubr.f32.mxu0 %v2294_v0  ;;  %1135 = vmatprep.mubr.f32.mxu1 %v2294_v0 }
 0x457   :  { %1897 = vmatpush1.bf16.msra.mxu0 %v2347_v14  ;;  %1929 = vmatpush1.bf16.msra.mxu1 %v2366_v37 }
 0x458   :  { %1899 = vmatprep.subr.bf16.mxu0 %v2350_v17  ;;  %1931 = vmatprep.subr.bf16.mxu1 %v2372_v45 }
 0x45b   :  { %1901 = vmatpush1.bf16.msra.mxu0 %v2357_v26  ;;  %1933 = vmatpush1.bf16.msra.mxu1 %v2378_v48 }
 0x45c   :  { %1903 = vmatprep.subr.bf16.mxu0 %v2361_v30  ;;  %1935 = vmatprep.subr.bf16.mxu1 %v2381_v52 }
 0x45f   :  { %1905 = vmatpush1.bf16.msra.mxu0 %v2370_v42  ;;  %1937 = vmatpush1.bf16.msra.mxu1 %v2390_v62 }
 0x460   :  { %1907 = vmatprep.subr.bf16.mxu0 %v2375_v46  ;;  %1939 = vmatprep.subr.bf16.mxu1 %v2393_v1 }
 0x463   :  { %1909 = vmatpush1.bf16.msra.mxu0 %v2384_v55  ;;  %1941 = vmatpush1.bf16.msra.mxu1 %v2402_v15 }
 0x464   :  { %1911 = vmatprep.subr.bf16.mxu0 %v2387_v58  ;;  %1943 = vmatprep.subr.bf16.mxu1 %v2405_v18 }
 0x467   :  { %1913 = vmatpush1.bf16.msra.mxu0 %v2396_v7  ;;  %1945 = vmatpush1.bf16.msra.mxu1 %v2414_v31 }
 0x468   :  { %1915 = vmatprep.subr.bf16.mxu0 %v2399_v10  ;;  %1947 = vmatprep.subr.bf16.mxu1 %v2417_v32 }
 0x46b   :  { %1917 = vmatpush1.bf16.msra.mxu0 %v2408_v24  ;;  %1949 = vmatpush1.bf16.msra.mxu1 %v2424_v40 }
 0x46c   :  { %1919 = vmatprep.subr.bf16.mxu0 %v2411_v27  ;;  %1951 = vmatprep.subr.bf16.mxu1 %v2427_v41 }
 0x46f   :  { %1921 = vmatpush1.bf16.msra.mxu0 %v2420_v39  ;;  %1953 = vmatpush1.bf16.msra.mxu1 %v2431_v47 }
 0x470   :  { %1955 = vmatprep.subr.bf16.mxu0 %v2339_v4  ;;  %1987 = vmatprep.subr.bf16.mxu1 %v2352_v22 }
 0x525   :  { %v889_v35 = vpop.f32.mrb[8].mxu0  ;;  %v960_v44 = vpop.f32.mrb[8].mxu1 }
 0x526   :  { %v965_v49 = vadd.f32 %v889_v35, %v819_v29  ;;  %v891_v50 = vpop.f32.mrb[9].mxu0  ;;  %v962_v51 = vpop.f32.mrb[9].mxu1  ;;  %v967_v59 = vadd.f32 %v960_v44, %v821_v57  ;;  %v997_v29 = vld [vmem:[#allocation4 + $0xa8] sm:$0xff] }
 0x527   :  { %v966_v53 = vadd.f32 %v891_v50, %v820_v34  ;;  %v968_v61 = vadd.f32 %v962_v51, %v822_v60 }
 0x528   :  { %v1558_v54 = vmul.f32 -1.442695, %v965_v49  ;;  %v1560_v63 = vmul.f32 -1.442695, %v967_v59  ;;  %v999_v59 = vld [vmem:[#allocation4 + $0xb8] sm:$0xff] }
 0x529   :  { %v1559_v56 = vmul.f32 -1.442695, %v966_v53 }
 0x52a   :  { %2154 = vpow2.f32 %v1558_v54 }
 0x52b   :  { %2156 = vpow2.f32 %v1559_v56  ;;  %v998_v56 = vld [vmem:[#allocation4 + $0xb0] sm:$0xff] }
 0x52c   :  { %2158 = vtanh.f32 %v968_v61 }
 0x52d   :  { %2160 = vpow2.f32 %v1560_v63 }
 0x534   :  { %v2155_v2 = vpop.eup %2154 }
 0x535   :  { %v978_v3 = vadd.f32 1.0, %v2155_v2  ;;  %v2157_v5 = vpop.eup %2156 }
 0x536   :  { %v979_v6 = vadd.f32 1.0, %v2157_v5  ;;  %v2159_v11 = vpop.eup %2158 }
 0x537   :  { %2162 = vrcp.f32 %v978_v3  ;;  %v2161_v12 = vpop.eup %2160 }
 0x538   :  { %2164 = vrcp.f32 %v979_v6  ;;  %v980_v20 = vadd.f32 1.0, %v2161_v12 }
 0x53a   :  { %2166 = vrcp.f32 %v980_v20 }
 0x541   :  { %v2163_v13 = vpop.eup %2162 }
 0x542   :  { %v989_v16 = vmul.f32 %v2163_v13, %v2159_v11  ;;  %v2165_v19 = vpop.eup %2164 }
 0x543   :  { %v988_v21 = vmul.f32 %v2165_v19, %v2587_v28  ;;  %v996_v28 = vld [vmem:[#allocation4 + $0xa0] sm:$0xff] }
 0x544   :  { %v2167_v36 = vpop.eup %2166 }
 0x545   :  { %v2625_v23 = vadd.f32 %v989_v16, %v988_v21 }
 0x547   :  { %2168 = vtanh.f32 %v2625_v23 }
 0x551   :  { %v2169_v38 = vpop.eup %2168 }
 0x552   :  { %v992_v43 = vmul.f32 %v2169_v38, %v2167_v36 }
 0x554   :  { %994 = vst [vmem:[#allocation9 + $0x20] sm:$0xff] %v992_v43  ;;  %1065 = vmatmul.mubr.f32.vlgmr.msra.gmra.mrb[10].mxu0 %v992_v43  ;;  %1136 = vmatmul.mubr.f32.vlgmr.msra.gmra.mrb[10].mxu1 %v992_v43 }
 0x555   :  { %1957 = vmatpush1.bf16.msra.mxu0 %v2341_v8  ;;  %1989 = vmatpush1.bf16.msra.mxu1 %v2354_v25 }
 0x556   :  { %1959 = vmatprep.subr.bf16.mxu0 %v2343_v9  ;;  %1991 = vmatprep.subr.bf16.mxu1 %v2364_v33 }
 0x557   :  { %1241 = vmatprep.mubr.f32.mxu0 %v2294_v0  ;;  %1312 = vmatprep.mubr.f32.mxu1 %v2294_v0 }
 0x559   :  { %1961 = vmatpush1.bf16.msra.mxu0 %v2347_v14  ;;  %1993 = vmatpush1.bf16.msra.mxu1 %v2366_v37 }
 0x55a   :  { %1963 = vmatprep.subr.bf16.mxu0 %v2350_v17  ;;  %1995 = vmatprep.subr.bf16.mxu1 %v2372_v45 }
 0x55d   :  { %1965 = vmatpush1.bf16.msra.mxu0 %v2357_v26  ;;  %1997 = vmatpush1.bf16.msra.mxu1 %v2378_v48 }
 0x55e   :  { %1967 = vmatprep.subr.bf16.mxu0 %v2361_v30  ;;  %1999 = vmatprep.subr.bf16.mxu1 %v2381_v52 }
 0x561   :  { %1969 = vmatpush1.bf16.msra.mxu0 %v2370_v42  ;;  %2001 = vmatpush1.bf16.msra.mxu1 %v2390_v62 }
 0x562   :  { %1971 = vmatprep.subr.bf16.mxu0 %v2375_v46  ;;  %2003 = vmatprep.subr.bf16.mxu1 %v2393_v1 }
 0x565   :  { %1973 = vmatpush1.bf16.msra.mxu0 %v2384_v55  ;;  %2005 = vmatpush1.bf16.msra.mxu1 %v2402_v15 }
 0x566   :  { %1975 = vmatprep.subr.bf16.mxu0 %v2387_v58  ;;  %2007 = vmatprep.subr.bf16.mxu1 %v2405_v18 }
 0x569   :  { %1977 = vmatpush1.bf16.msra.mxu0 %v2396_v7  ;;  %2009 = vmatpush1.bf16.msra.mxu1 %v2414_v31 }
 0x56a   :  { %1979 = vmatprep.subr.bf16.mxu0 %v2399_v10  ;;  %2011 = vmatprep.subr.bf16.mxu1 %v2417_v32 }
 0x56d   :  { %1981 = vmatpush1.bf16.msra.mxu0 %v2408_v24  ;;  %2013 = vmatpush1.bf16.msra.mxu1 %v2424_v40 }
 0x56e   :  { %1983 = vmatprep.subr.bf16.mxu0 %v2411_v27  ;;  %2015 = vmatprep.subr.bf16.mxu1 %v2427_v41 }
 0x571   :  { %1985 = vmatpush1.bf16.msra.mxu0 %v2420_v39  ;;  %2017 = vmatpush1.bf16.msra.mxu1 %v2431_v47 }
 0x572   :  { %2019 = vmatprep.subr.bf16.mxu0 %v2339_v4  ;;  %2051 = vmatprep.subr.bf16.mxu1 %v2352_v22 }
 0x627   :  { %v1066_v34 = vpop.f32.mrb[10].mxu0  ;;  %v1137_v35 = vpop.f32.mrb[10].mxu1 }
 0x628   :  { %v1142_v44 = vadd.f32 %v1066_v34, %v996_v28  ;;  %v1068_v49 = vpop.f32.mrb[11].mxu0  ;;  %v1139_v50 = vpop.f32.mrb[11].mxu1  ;;  %v1144_v57 = vadd.f32 %v1137_v35, %v998_v56 }
 0x629   :  { %v1143_v51 = vadd.f32 %v1068_v49, %v997_v29  ;;  %v1145_v60 = vadd.f32 %v1139_v50, %v999_v59  ;;  %v1352_v50 = vld [vmem:[#allocation4 + $0xf0] sm:$0xff] }
 0x62a   :  { %v1561_v53 = vmul.f32 -1.442695, %v1142_v44  ;;  %v1563_v61 = vmul.f32 -1.442695, %v1144_v57 }
 0x62b   :  { %v1562_v54 = vmul.f32 -1.442695, %v1143_v51 }
 0x62c   :  { %2170 = vpow2.f32 %v1561_v53  ;;  %v1353_v53 = vld [vmem:[#allocation4 + $0xf8] sm:$0xff] }
 0x62d   :  { %2172 = vpow2.f32 %v1562_v54 }
 0x62e   :  { %2174 = vtanh.f32 %v1145_v60 }
 0x62f   :  { %2176 = vpow2.f32 %v1563_v61 }
 0x636   :  { %v2171_v4 = vpop.eup %2170 }
 0x637   :  { %v1155_v63 = vadd.f32 1.0, %v2171_v4  ;;  %v2173_v22 = vpop.eup %2172 }
 0x638   :  { %v1156_v2 = vadd.f32 1.0, %v2173_v22  ;;  %v2175_v3 = vpop.eup %2174 }
 0x639   :  { %2178 = vrcp.f32 %v1155_v63  ;;  %v2177_v5 = vpop.eup %2176 }
 0x63a   :  { %2180 = vrcp.f32 %v1156_v2  ;;  %v1157_v13 = vadd.f32 1.0, %v2177_v5 }
 0x63c   :  { %2182 = vrcp.f32 %v1157_v13 }
 0x643   :  { %v2179_v6 = vpop.eup %2178 }
 0x644   :  { %v1166_v11 = vmul.f32 %v2179_v6, %v2175_v3  ;;  %v2181_v12 = vpop.eup %2180 }
 0x645   :  { %v1165_v16 = vmul.f32 %v2181_v12, %v2625_v23  ;;  %v1351_v23 = vld [vmem:[#allocation4 + $0xe8] sm:$0xff] }
 0x646   :  { %v2183_v20 = vpop.eup %2182 }
 0x647   :  { %v2663_v19 = vadd.f32 %v1166_v11, %v1165_v16 }
 0x649   :  { %2184 = vtanh.f32 %v2663_v19 }
 0x653   :  { %v2185_v21 = vpop.eup %2184 }
 0x654   :  { %v1169_v36 = vmul.f32 %v2185_v21, %v2183_v20 }
 0x656   :  { %1171 = vst [vmem:[#allocation9 + $0x28] sm:$0xff] %v1169_v36  ;;  %1242 = vmatmul.mubr.f32.vlgmr.msra.gmra.mrb[12].mxu0 %v1169_v36  ;;  %1313 = vmatmul.mubr.f32.vlgmr.msra.gmra.mrb[12].mxu1 %v1169_v36 }
 0x657   :  { %2021 = vmatpush1.bf16.msra.mxu0 %v2341_v8  ;;  %2053 = vmatpush1.bf16.msra.mxu1 %v2354_v25  ;;  %v1174_v8 = vld [vmem:[#allocation4 + $0xc8] sm:$0xff] }
 0x658   :  { %2023 = vmatprep.subr.bf16.mxu0 %v2343_v9  ;;  %2055 = vmatprep.subr.bf16.mxu1 %v2364_v33 }
 0x659   :  { %1418 = vmatprep.mubr.f32.mxu0 %v2294_v0  ;;  %1489 = vmatprep.mubr.f32.mxu1 %v2294_v0  ;;  %v1173_v0 = vld [vmem:[#allocation4 + $0xc0] sm:$0xff] }
 0x65b   :  { %2025 = vmatpush1.bf16.msra.mxu0 %v2347_v14  ;;  %2057 = vmatpush1.bf16.msra.mxu1 %v2366_v37 }
 0x65c   :  { %2027 = vmatprep.subr.bf16.mxu0 %v2350_v17  ;;  %2059 = vmatprep.subr.bf16.mxu1 %v2372_v45 }
 0x65f   :  { %2029 = vmatpush1.bf16.msra.mxu0 %v2357_v26  ;;  %2061 = vmatpush1.bf16.msra.mxu1 %v2378_v48 }
 0x660   :  { %2031 = vmatprep.subr.bf16.mxu0 %v2361_v30  ;;  %2063 = vmatprep.subr.bf16.mxu1 %v2381_v52 }
 0x663   :  { %2033 = vmatpush1.bf16.msra.mxu0 %v2370_v42  ;;  %2065 = vmatpush1.bf16.msra.mxu1 %v2390_v62  ;;  %v1175_v42 = vld [vmem:[#allocation4 + $0xd0] sm:$0xff] }
 0x664   :  { %2035 = vmatprep.subr.bf16.mxu0 %v2375_v46  ;;  %2067 = vmatprep.subr.bf16.mxu1 %v2393_v1  ;;  %v1176_v46 = vld [vmem:[#allocation4 + $0xd8] sm:$0xff] }
 0x667   :  { %2037 = vmatpush1.bf16.msra.mxu0 %v2384_v55  ;;  %2069 = vmatpush1.bf16.msra.mxu1 %v2402_v15 }
 0x668   :  { %2039 = vmatprep.subr.bf16.mxu0 %v2387_v58  ;;  %2071 = vmatprep.subr.bf16.mxu1 %v2405_v18 }
 0x66b   :  { %2041 = vmatpush1.bf16.msra.mxu0 %v2396_v7  ;;  %2073 = vmatpush1.bf16.msra.mxu1 %v2414_v31 }
 0x66c   :  { %2043 = vmatprep.subr.bf16.mxu0 %v2399_v10  ;;  %2075 = vmatprep.subr.bf16.mxu1 %v2417_v32 }
 0x66f   :  { %2045 = vmatpush1.bf16.msra.mxu0 %v2408_v24  ;;  %2077 = vmatpush1.bf16.msra.mxu1 %v2424_v40 }
 0x670   :  { %2047 = vmatprep.subr.bf16.mxu0 %v2411_v27  ;;  %2079 = vmatprep.subr.bf16.mxu1 %v2427_v41 }
 0x673   :  { %2049 = vmatpush1.bf16.msra.mxu0 %v2420_v39  ;;  %2081 = vmatpush1.bf16.msra.mxu1 %v2431_v47  ;;  %v1350_v47 = vld [vmem:[#allocation4 + $0xe0] sm:$0xff] }
 0x729   :  { %v1243_v9 = vpop.f32.mrb[12].mxu0  ;;  %v1314_v14 = vpop.f32.mrb[12].mxu1 }
 0x72a   :  { %v1319_v17 = vadd.f32 %v1243_v9, %v1173_v0  ;;  %v1245_v25 = vpop.f32.mrb[13].mxu0  ;;  %v1316_v26 = vpop.f32.mrb[13].mxu1  ;;  %v1321_v45 = vadd.f32 %v1314_v14, %v1175_v42 }
 0x72b   :  { %v1320_v30 = vadd.f32 %v1245_v25, %v1174_v8  ;;  %v1322_v48 = vadd.f32 %v1316_v26, %v1176_v46 }
 0x72c   :  { %v1564_v33 = vmul.f32 -1.442695, %v1319_v17  ;;  %v1566_v52 = vmul.f32 -1.442695, %v1321_v45 }
 0x72d   :  { %v1565_v37 = vmul.f32 -1.442695, %v1320_v30 }
 0x72e   :  { %2186 = vpow2.f32 %v1564_v33 }
 0x72f   :  { %2188 = vpow2.f32 %v1565_v37 }
 0x730   :  { %2190 = vtanh.f32 %v1322_v48 }
 0x731   :  { %2192 = vpow2.f32 %v1566_v52 }
 0x738   :  { %v2187_v55 = vpop.eup %2186 }
 0x739   :  { %v1332_v58 = vadd.f32 1.0, %v2187_v55  ;;  %v2189_v62 = vpop.eup %2188 }
 0x73a   :  { %v1333_v1 = vadd.f32 1.0, %v2189_v62  ;;  %v2191_v7 = vpop.eup %2190 }
 0x73b   :  { %2194 = vrcp.f32 %v1332_v58  ;;  %v2193_v10 = vpop.eup %2192 }
 0x73c   :  { %2196 = vrcp.f32 %v1333_v1  ;;  %v1334_v27 = vadd.f32 1.0, %v2193_v10 }
 0x73e   :  { %2198 = vrcp.f32 %v1334_v27 }
 0x745   :  { %v2195_v15 = vpop.eup %2194 }
 0x746   :  { %v1343_v18 = vmul.f32 %v2195_v15, %v2191_v7  ;;  %v2197_v24 = vpop.eup %2196 }
 0x747   :  { %v1342_v31 = vmul.f32 %v2197_v24, %v2663_v19 }
 0x748   :  { %v2199_v39 = vpop.eup %2198 }
 0x749   :  { %v1344_v32 = vadd.f32 %v1343_v18, %v1342_v31 }
 0x74b   :  { %2200 = vtanh.f32 %v1344_v32 }
 0x755   :  { %v2201_v40 = vpop.eup %2200 }
 0x756   :  { %v1346_v41 = vmul.f32 %v2201_v40, %v2199_v39 }
 0x758   :  { %1348 = vst [vmem:[#allocation9 + $0x30] sm:$0xff] %v1346_v41  ;;  %1419 = vmatmul.mubr.f32.vlgmr.msra.gmra.mrb[14].mxu0 %v1346_v41  ;;  %1490 = vmatmul.mubr.f32.vlgmr.msra.gmra.mrb[14].mxu1 %v1346_v41 }
 0x82b   :  { %v1420_v38 = vpop.f32.mrb[14].mxu0  ;;  %v1491_v43 = vpop.f32.mrb[14].mxu1 }
 0x82c   :  { %v1496_v28 = vadd.f32 %v1420_v38, %v1350_v47  ;;  %v1422_v29 = vpop.f32.mrb[15].mxu0  ;;  %v1493_v34 = vpop.f32.mrb[15].mxu1  ;;  %v1498_v51 = vadd.f32 %v1491_v43, %v1352_v50 }
 0x82d   :  { %v1497_v35 = vadd.f32 %v1422_v29, %v1351_v23  ;;  %v1499_v54 = vadd.f32 %v1493_v34, %v1353_v53 }
 0x82e   :  { %v1567_v44 = vmul.f32 -1.442695, %v1496_v28  ;;  %v1569_v56 = vmul.f32 -1.442695, %v1498_v51 }
 0x82f   :  { %v1568_v49 = vmul.f32 -1.442695, %v1497_v35 }
 0x830   :  { %2202 = vpow2.f32 %v1567_v44 }
 0x831   :  { %2204 = vpow2.f32 %v1568_v49 }
 0x832   :  { %2206 = vtanh.f32 %v1499_v54 }
 0x833   :  { %2208 = vpow2.f32 %v1569_v56 }
 0x83a   :  { %v2203_v57 = vpop.eup %2202 }
 0x83b   :  { %v1509_v59 = vadd.f32 1.0, %v2203_v57  ;;  %v2205_v60 = vpop.eup %2204 }
 0x83c   :  { %v1510_v61 = vadd.f32 1.0, %v2205_v60  ;;  %v2207_v4 = vpop.eup %2206 }
 0x83d   :  { %2210 = vrcp.f32 %v1509_v59  ;;  %v2209_v63 = vpop.eup %2208 }
 0x83e   :  { %2212 = vrcp.f32 %v1510_v61  ;;  %v1511_v5 = vadd.f32 1.0, %v2209_v63 }
 0x840   :  { %2214 = vrcp.f32 %v1511_v5 }
 0x847   :  { %v2211_v22 = vpop.eup %2210 }
 0x848   :  { %v1520_v2 = vmul.f32 %v2211_v22, %v2207_v4  ;;  %v2213_v3 = vpop.eup %2212 }
 0x849   :  { %v1519_v6 = vmul.f32 %v2213_v3, %v1344_v32 }
 0x84a   :  { %v2215_v12 = vpop.eup %2214 }
 0x84b   :  { %v1521_v11 = vadd.f32 %v1520_v2, %v1519_v6 }
 0x84d   :  { %2216 = vtanh.f32 %v1521_v11 }
 0x857   :  { %v2217_v13 = vpop.eup %2216 }
 0x858   :  { %v1523_v16 = vmul.f32 %v2217_v13, %v2215_v12 }
 0x85a   :  { %1525 = vst [vmem:[#allocation9 + $0x38] sm:$0xff] %v1523_v16 }
 0x85b   :  { %2273 = shalt.err (!%p2270_p6)
}
 0x85c   :  { %s2274_s10 = scalar_lea.hbm %s2713_s2, 1024 }
 0x85d   :  { %p2275_p7 = scmp.ne.s32.totalorder %s2713_s2, %s2274_s10  ;;  %p2278_p8 = scmp.lt.u32.totalorder %s2274_s10, %s2713_s2 }
 0x85f   :  { %p2280_p9 = pnand %p2278_p8, %p2275_p7 }
 0x861   :  { %2283 = shalt.err (!%p2280_p9)
}
 0x862   :  { %s2296_s15 = smov 128   ;;  %s2297_s16 = smov 8  }
 0x863   :  { %1539 = dma.vmem_to_hbm [thread:$0]  %s1534_s6, 1024, %s2713_s2, [#allocation6], %s2296_s15, %s2296_s15, %s2297_s16  }
 0x864   :  { %2288 = dma.done.wait [#allocation6], 1024  }
 0x865   :  { %2289 = vsyncadd [#allocation6], 4294966272 }
 0x866   :  { %1543 = vsyncpa [#allocation5], 1 }
 0x867   :  { %1544 = vsyncpa [#allocation8], 1 }
 0x868   :  { %1545 = vsyncpa [#allocation6], 1 }

</bundles_post_ra>
